<compile_context>
chip_gen: v5e
topology: v5e:2x2
jax: 0.10.0
libtpu: 0.0.40
codegen_flags: <defaults>
</compile_context>

<pallas_src>
import jax
import jax.numpy as jnp
from jax.experimental import pallas as pl
from jax.experimental.pallas import tpu as pltpu


def _label_bilinear_kernel(x1_ref, x2_ref, wb_ref, lw1_ref, lw2_ref, b_ref,
                           o_ref):
    x1 = x1_ref[...]                       # (TM, D1)   compute dtype
    x2 = x2_ref[...]                       # (TM, D2)   compute dtype
    tm, d2 = x2.shape
    kc = o_ref.shape[-1]

    # ---- Bilinear part: one big MXU matmul, labels lane-dense ----
    # wb_blk[i, j*KC + k'] = W_bil[chunk*KC + k', i, j]
    z = jnp.dot(x1, wb_ref[...], preferred_element_type=jnp.float32)  # (TM, D2*KC)
    z3 = z.reshape(tm, d2, kc)                                        # split minor at 128-mult
    x2f = x2.astype(jnp.float32)
    # Group-sum over j: lane-broadcast of x2 + VPU multiply + sublane-reduce.
    bil = jnp.sum(z3 * x2f[:, :, None], axis=1)                       # (TM, KC) f32

    # ---- Linear part: cat(x1, x2) @ W_lin^T == x1 @ lw1 + x2 @ lw2 ----
    lin = jnp.dot(x1, lw1_ref[...], preferred_element_type=jnp.float32)
    lin = lin + jnp.dot(x2, lw2_ref[...], preferred_element_type=jnp.float32)

    # f32 epilogue (native VPU path on v5e/v6e/v7x).
    o_ref[...] = (bil + lin + b_ref[...]).astype(o_ref.dtype)


def pack_label_bilinear_params(w_bil, b_bil, w_lin, *, label_chunk=128,
                               compute_dtype=jnp.bfloat16):
    """One-time weight relayout / padding / cast (hoist out of the hot path).

    w_bil: (K, D1, D2), b_bil: (K,), w_lin: (K, D1+D2)  [nn.Bilinear/nn.Linear]
    """
    K, D1, D2 = w_bil.shape
    KC = max(128, ((int(label_chunk) + 127) // 128) * 128)   # lane-dense chunk
    Kpad = pl.cdiv(K, KC) * KC
    nchunks = Kpad // KC

    # (Kpad, D1, D2) -> (nchunks, KC, D1, D2) -> (D1, nchunks, D2, KC)
    #               -> (D1, nchunks*D2*KC), labels minor within each chunk.
    wp = jnp.pad(w_bil, ((0, Kpad - K), (0, 0), (0, 0)))
    wb2d = (wp.reshape(nchunks, KC, D1, D2)
              .transpose(2, 0, 3, 1)
              .reshape(D1, nchunks * D2 * KC)
              .astype(compute_dtype))

    # Linear weight split into the x1 / x2 halves, transposed, K-padded.
    lw1 = jnp.pad(w_lin[:, :D1].T, ((0, 0), (0, Kpad - K))).astype(compute_dtype)
    lw2 = jnp.pad(w_lin[:, D1:].T, ((0, 0), (0, Kpad - K))).astype(compute_dtype)
    bias2d = jnp.pad(b_bil.reshape(1, K), ((0, 0), (0, Kpad - K))).astype(jnp.float32)

    return dict(wb2d=wb2d, lw1=lw1, lw2=lw2, bias=bias2d,
                K=K, D1=D1, D2=D2, Kpad=Kpad, KC=KC,
                compute_dtype=compute_dtype)


def label_bilinear_apply(params, x1, x2, *, row_tile=256):
    """x1: (B, L, D1), x2: (B, L, D2) -> (B, L, K)."""
    B, L, D1 = x1.shape
    _, _, D2 = x2.shape
    assert D1 == params["D1"] and D2 == params["D2"]
    K, Kpad, KC = params["K"], params["Kpad"], params["KC"]
    compute_dtype = params["compute_dtype"]
    N = B * L

    # Row tile: multiple of 8, no larger than needed; no host-side row padding
    # (the partial last row block is masked by Pallas; rows are independent).
    rt = max(8, min(((int(row_tile) + 7) // 8) * 8, ((N + 7) // 8) * 8))
    grid = (pl.cdiv(N, rt), Kpad // KC)

    x1f = x1.reshape(N, D1).astype(compute_dtype)
    x2f = x2.reshape(N, D2).astype(compute_dtype)

    out_flat = pl.pallas_call(
        _label_bilinear_kernel,
        out_shape=jax.ShapeDtypeStruct((N, Kpad), jnp.float32),
        grid_spec=pltpu.PrefetchScalarGridSpec(
            num_scalar_prefetch=0,
            grid=grid,
            in_specs=[
                pl.BlockSpec((rt, D1), lambda i, c: (i, 0)),        # x1 rows
                pl.BlockSpec((rt, D2), lambda i, c: (i, 0)),        # x2 rows
                pl.BlockSpec((D1, D2 * KC), lambda i, c: (0, c)),   # bilinear weight chunk
                pl.BlockSpec((D1, KC), lambda i, c: (0, c)),        # linear weight (x1 half)
                pl.BlockSpec((D2, KC), lambda i, c: (0, c)),        # linear weight (x2 half)
                pl.BlockSpec((1, KC), lambda i, c: (0, c)),         # bias chunk
            ],
            out_specs=pl.BlockSpec((rt, KC), lambda i, c: (i, c)),
        ),
        compiler_params=pltpu.CompilerParams(
            # No cross-step reductions: both axes shard across v7x's 2 TCs.
            dimension_semantics=("parallel", "parallel"),
            # Safe on v5e/v6e (128 MiB) and under v7x's 64 MiB physical VMEM.
            vmem_limit_bytes=48 * 1024 * 1024),
    )(x1f, x2f, params["wb2d"], params["lw1"], params["lw2"], params["bias"])

    return out_flat[:, :K].reshape(B, L, K)


def label_bilinear(x1, x2, w_bil, b_bil, w_lin, *, row_tile=256,
                   compute_dtype=jnp.bfloat16, label_chunk=128):
    """Convenience one-shot wrapper (packs weights then applies)."""
    params = pack_label_bilinear_params(w_bil, b_bil, w_lin,
                                        label_chunk=label_chunk,
                                        compute_dtype=compute_dtype)
    return label_bilinear_apply(params, x1, x2, row_tile=row_tile)


def label_bilinear_ref(x1, x2, w_bil, b_bil, w_lin):
    """Plain-JAX reference matching nn.Bilinear + nn.Linear(cat)."""
    bil = jnp.einsum('bli,kij,blj->blk', x1, w_bil, x2) + b_bil
    lin = jnp.einsum('blc,kc->blk', jnp.concatenate([x1, x2], axis=2), w_lin)
    return bil + lin


if __name__ == "__main__":
    def run_case(key, B, L, in1, in2, num_label, *, compute_dtype,
                 row_tile=256, atol, rtol):
        k1, k2, k3, k4, k5 = jax.random.split(key, 5)
        x1 = jax.random.normal(k1, (B, L, in1), dtype=jnp.float32)
        x2 = jax.random.normal(k2, (B, L, in2), dtype=jnp.float32)
        w_bil = 0.1 * jax.random.normal(k3, (num_label, in1, in2), dtype=jnp.float32)
        b_bil = 0.1 * jax.random.normal(k4, (num_label,), dtype=jnp.float32)
        w_lin = 0.1 * jax.random.normal(k5, (num_label, in1 + in2), dtype=jnp.float32)

        params = pack_label_bilinear_params(w_bil, b_bil, w_lin,
                                            compute_dtype=compute_dtype)
        out = jax.block_until_ready(
            label_bilinear_apply(params, x1, x2, row_tile=row_tile))

        # Reference on the same (possibly bf16-rounded) operands, f32 math,
        # so only accumulation-order / precision differences remain.
        def rnd(a):
            return a.astype(compute_dtype).astype(jnp.float32)
        ref = label_bilinear_ref(rnd(x1), rnd(x2), rnd(w_bil), b_bil, rnd(w_lin))

        assert out.shape == (B, L, num_label)
        err = float(jnp.max(jnp.abs(out - ref)))
        assert jnp.allclose(out, ref, atol=atol, rtol=rtol), f"mismatch, max|d|={err}"

    key = jax.random.PRNGKey(0)
    ka, kb, kc, kd = jax.random.split(key, 4)
    # bf16 MXU path (default), multiple row tiles (row_tile=8 over N=16).
    run_case(ka, B=2, L=8, in1=32, in2=32, num_label=8,
             compute_dtype=jnp.bfloat16, row_tile=8, atol=2e-2, rtol=2e-2)
    # Row tail (B*L=15 not a multiple of 8) + label padding (K=5 -> 128).
    run_case(kb, B=3, L=5, in1=48, in2=24, num_label=5,
             compute_dtype=jnp.bfloat16, atol=2e-2, rtol=2e-2)
    # Multi-chunk labels (K=130 -> 2 chunks of 128) + partial row block.
    run_case(kc, B=2, L=9, in1=32, in2=32, num_label=130,
             compute_dtype=jnp.bfloat16, atol=2e-2, rtol=2e-2)
    # Full f32 compute path (v5e-safe option), tight tolerance.
    run_case(kd, B=2, L=8, in1=32, in2=32, num_label=8,
             compute_dtype=jnp.float32, atol=2e-3, rtol=2e-3)

    print("KERNEL_OK")
</pallas_src>

<mosaic_0001>
module attributes {stable_mosaic.version = 11 : i64} {
  func.func @_label_bilinear_kernel(%arg0: i32, %arg1: i32, %arg2: memref<8x32xbf16, #tpu.memory_space<vmem>>, %arg3: memref<8x32xbf16, #tpu.memory_space<vmem>>, %arg4: memref<32x4096xbf16, #tpu.memory_space<vmem>>, %arg5: memref<32x128xbf16, #tpu.memory_space<vmem>>, %arg6: memref<32x128xbf16, #tpu.memory_space<vmem>>, %arg7: memref<1x128xf32, #tpu.memory_space<vmem>>, %arg8: memref<8x128xf32, #tpu.memory_space<vmem>>) attributes {dimension_semantics = [#tpu.dimension_semantics<parallel>, #tpu.dimension_semantics<parallel>], iteration_bounds = array<i64: 2, 1>, scalar_prefetch = 0 : i64, scratch_operands = 0 : i64, tpu.core_type = #tpu.core_type<tc>, window_params = [{transform_indices = @transform_0, window_bounds = array<i64: 8, 32>}, {transform_indices = @transform_1, window_bounds = array<i64: 8, 32>}, {transform_indices = @transform_2, window_bounds = array<i64: 32, 4096>}, {transform_indices = @transform_3, window_bounds = array<i64: 32, 128>}, {transform_indices = @transform_4, window_bounds = array<i64: 32, 128>}, {transform_indices = @transform_5, window_bounds = array<i64: 1, 128>}, {transform_indices = @transform_6, window_bounds = array<i64: 8, 128>}]} {
    %c0 = arith.constant 0 : index
    %c0_0 = arith.constant 0 : index
    %0 = vector.load %arg2[%c0, %c0_0] : memref<8x32xbf16, #tpu.memory_space<vmem>>, vector<8x32xbf16>
    %c0_1 = arith.constant 0 : index
    %c0_2 = arith.constant 0 : index
    %1 = vector.load %arg3[%c0_1, %c0_2] : memref<8x32xbf16, #tpu.memory_space<vmem>>, vector<8x32xbf16>
    %c0_3 = arith.constant 0 : index
    %c0_4 = arith.constant 0 : index
    %2 = vector.load %arg4[%c0_3, %c0_4] : memref<32x4096xbf16, #tpu.memory_space<vmem>>, vector<32x4096xbf16>
    %cst = arith.constant dense<0.000000e+00> : vector<8x4096xf32>
    %3 = tpu.matmul %0, %2, %cst {dimension_numbers = #tpu.dot_dimension_numbers<[1], [0], [0], [1], [0, 0, 1, 1], [], []>} : vector<8x32xbf16>, vector<32x4096xbf16>, vector<8x4096xf32> -> vector<8x4096xf32>
    %4 = vector.shape_cast %3 : vector<8x4096xf32> to vector<8x32x128xf32>
    %5 = arith.extf %1 : vector<8x32xbf16> to vector<8x32xf32>
    %6 = vector.shape_cast %5 : vector<8x32xf32> to vector<8x32x1xf32>
    %7 = vector.broadcast %6 : vector<8x32x1xf32> to vector<8x32x128xf32>
    %8 = arith.mulf %4, %7 : vector<8x32x128xf32>
    %cst_5 = arith.constant dense<0.000000e+00> : vector<8x128xf32>
    %9 = vector.multi_reduction <add>, %8, %cst_5 [1] : vector<8x32x128xf32> to vector<8x128xf32>
    %c0_6 = arith.constant 0 : index
    %c0_7 = arith.constant 0 : index
    %10 = vector.load %arg5[%c0_6, %c0_7] : memref<32x128xbf16, #tpu.memory_space<vmem>>, vector<32x128xbf16>
    %cst_8 = arith.constant dense<0.000000e+00> : vector<8x128xf32>
    %11 = tpu.matmul %0, %10, %cst_8 {dimension_numbers = #tpu.dot_dimension_numbers<[1], [0], [0], [1], [0, 0, 1, 1], [], []>} : vector<8x32xbf16>, vector<32x128xbf16>, vector<8x128xf32> -> vector<8x128xf32>
    %c0_9 = arith.constant 0 : index
    %c0_10 = arith.constant 0 : index
    %12 = vector.load %arg6[%c0_9, %c0_10] : memref<32x128xbf16, #tpu.memory_space<vmem>>, vector<32x128xbf16>
    %cst_11 = arith.constant dense<0.000000e+00> : vector<8x128xf32>
    %13 = tpu.matmul %1, %12, %cst_11 {dimension_numbers = #tpu.dot_dimension_numbers<[1], [0], [0], [1], [0, 0, 1, 1], [], []>} : vector<8x32xbf16>, vector<32x128xbf16>, vector<8x128xf32> -> vector<8x128xf32>
    %14 = arith.addf %11, %13 : vector<8x128xf32>
    %15 = arith.addf %9, %14 : vector<8x128xf32>
    %c0_12 = arith.constant 0 : index
    %c0_13 = arith.constant 0 : index
    %16 = vector.load %arg7[%c0_12, %c0_13] : memref<1x128xf32, #tpu.memory_space<vmem>>, vector<1x128xf32>
    %17 = vector.broadcast %16 : vector<1x128xf32> to vector<8x128xf32>
    %18 = arith.addf %15, %17 : vector<8x128xf32>
    %c0_14 = arith.constant 0 : index
    %c0_15 = arith.constant 0 : index
    %19 = vector.load %arg8[%c0_14, %c0_15] : memref<8x128xf32, #tpu.memory_space<vmem>>, vector<8x128xf32>
    tpu.vector_store %arg8[%c0_14, %c0_15], %18 {strides = array<i32>} : memref<8x128xf32, #tpu.memory_space<vmem>>, vector<8x128xf32>,
    return
  }
  func.func @transform_0(%arg0: i32, %arg1: i32) -> (i32, i32) {
    %c0_i32 = arith.constant 0 : i32
    %c0_i32_0 = arith.constant 0 : i32
    return %arg0, %c0_i32 : i32, i32
  }
  func.func @transform_1(%arg0: i32, %arg1: i32) -> (i32, i32) {
    %c0_i32 = arith.constant 0 : i32
    %c0_i32_0 = arith.constant 0 : i32
    return %arg0, %c0_i32 : i32, i32
  }
  func.func @transform_2(%arg0: i32, %arg1: i32) -> (i32, i32) {
    %c0_i32 = arith.constant 0 : i32
    %c0_i32_0 = arith.constant 0 : i32
    return %c0_i32, %arg1 : i32, i32
  }
  func.func @transform_3(%arg0: i32, %arg1: i32) -> (i32, i32) {
    %c0_i32 = arith.constant 0 : i32
    %c0_i32_0 = arith.constant 0 : i32
    return %c0_i32, %arg1 : i32, i32
  }
  func.func @transform_4(%arg0: i32, %arg1: i32) -> (i32, i32) {
    %c0_i32 = arith.constant 0 : i32
    %c0_i32_0 = arith.constant 0 : i32
    return %c0_i32, %arg1 : i32, i32
  }
  func.func @transform_5(%arg0: i32, %arg1: i32) -> (i32, i32) {
    %c0_i32 = arith.constant 0 : i32
    %c0_i32_0 = arith.constant 0 : i32
    return %c0_i32, %arg1 : i32, i32
  }
  func.func @transform_6(%arg0: i32, %arg1: i32) -> (i32, i32) {
    %c0_i32 = arith.constant 0 : i32
    return %arg0, %arg1 : i32, i32
  }
}

</mosaic_0001>

<bundles_post_ra>
// kernel: tpu_custom_call.1
= control target key start
LH: loop header
LB: loop body
LE: loop exit
PB: predicated region body
PF: predicated region fallthrough
CT: control target
= control target key end

     0   :  { %s3764_s0 = inlined_call_operand.hbm [shape: bf16[16,32], index: 0, kind: input, shape index: {}]   ;;  %s3765_s1 = inlined_call_operand.hbm [shape: bf16[16,32], index: 1, kind: input, shape index: {}]   ;;  %s3766_s2 = inlined_call_operand.hbm [shape: bf16[32,4096], index: 2, kind: input, shape index: {}]   ;;  %s3767_s3 = inlined_call_operand.hbm [shape: bf16[32,128], index: 3, kind: input, shape index: {}]   ;;  %s3768_s4 = inlined_call_operand.hbm [shape: bf16[32,128], index: 4, kind: input, shape index: {}]   ;;  %s3769_s5 = inlined_call_operand.vmem [shape: f32[1,128], index: 5, kind: input, shape index: {}]   ;;  %s3770_s6 = inlined_call_operand.hbm [shape: f32[16,128], index: 6, kind: output, shape index: {}]  }
   0x1   :  { %3774 = sst [smem:[#allocation21_spill]] %s3766_s2 }
   0x2   :  { %3775 = sst [smem:[#allocation22_spill]] %s3767_s3 }
   0x3   :  { %3776 = sst [smem:[#allocation23_spill]] %s3768_s4 }
   0x4   :  { %11 = vsyncpa [#allocation3], 0 }
   0x5   :  { %13 = vsyncpa [#allocation3 + $0x1], 0 }
   0x6   :  { %14 = vsyncpa [#allocation6], 0 }
   0x7   :  { %16 = vsyncpa [#allocation6 + $0x1], 0 }
   0x8   :  { %17 = vsyncpa [#allocation9], 0 }
   0x9   :  { %18 = vsyncpa [#allocation4], 0 }
   0xa   :  { %20 = vsyncpa [#allocation4 + $0x1], 0  ;;  %s3149_s21 = smov 0   ;;  %s3151_s22 = smov 0  }
   0xb   :  { %s3153_s23 = smov 0   ;;  %s3155_s24 = smov 0  }
   0xc   :  { %s3157_s25 = smov 0   ;;  %s3159_s26 = smov 0  }
   0xd LB: > { %3777 = sst [smem:[#allocation17_spill]] %s3091_s23  ;;  %s3180_s27 = sadd.s32 4294967295, %s3103_s26   ;;  %s3103_s26 = sphi %s3159_s26, %s26_s26   ;;  %s3099_s25 = sphi %s3157_s25, %s3793_s25   ;;  %s3095_s24 = sphi %s3155_s24, %s3792_s24   ;;  %s3091_s23 = sphi %s3153_s23, %s3791_s23   ;;  %s3087_s22 = sphi %s3151_s22, %s3795_s22   ;;  %s3083_s21 = sphi %s3149_s21, %s3794_s21  }
   0xe   : > { %3778 = sst [smem:[#allocation18_spill]] %s3099_s25  ;;  %p2264_p0 = scmp.ge.s32.totalorder %s3103_s26, 1 }
   0xf   : > { %p59_p1 = scmp.eq.s32.totalorder %s3180_s27, 0  ;;  %p227_p2 = scmp.lt.s32.totalorder %s3103_s26, 3 }
  0x10   : > { %s3779_s2 = sld [smem:[#allocation21_spill]]  ;;  %s3105_s8 = smov [#allocation7]  }
  0x11   : > { %p3188_p3 = pnand %p2264_p0, %p227_p2  ;;  %s243_s9 = sshll.u32 %s3105_s8, 4  ;;  %s244_s9 = int_to_ptr.vmem [resolvable:$true] %s243_s9 }
  0x12   : > { %p2269_p6 = scmp.ge.s32.totalorder %s3103_s26, 2  ;;  %s3782_s3 = sld [smem:[#allocation22_spill]] }
  0x13   : > { %p2677_p4 = pneg %p3188_p3  ;;  %s3106_s14 = smov 2048  }
  0x14   : > { %s3107_s15 = smov 128   ;;  %s3108_s16 = smov [#allocation8]  }
  0x15   : > { %p3196_p5 = pnand %p2677_p4, %p59_p1  ;;  %s259_s17 = sshll.u32 %s3108_s16, 4  ;;  %s260_s17 = int_to_ptr.vmem [resolvable:$true] %s259_s17 }
  0x16   : > { %s241_s30 = sshll.u32 %s3779_s2, 4  ;;  %s3109_s18 = smov 64   ;;  %s242_s30 = int_to_ptr.hbm [resolvable:$true] %s241_s30 }
  0x17   : > { %2680 = dma.hbm_to_vmem [thread:$0]  (!%p3196_p5), %s242_s30, 8192, %s244_s9, [#allocation6], %s3106_s14, %s3106_s14, %s3107_s15  }
  0x18   : > { %s257_s13 = sshll.u32 %s3782_s3, 4  ;;  %s3110_s19 = smov 4   ;;  %s258_s13 = int_to_ptr.hbm [resolvable:$true] %s257_s13 }
  0x19   : > { %2683 = dma.hbm_to_vmem [thread:$0]  (!%p3196_p5), %s258_s13, 256, %s260_s17, [#allocation9], %s3109_s18, %s3109_s18, %s3110_s19  }
  0x1a   : > { %s3783_s4 = sld [smem:[#allocation23_spill]]  ;;  %s3111_s30 = smov [#allocation10]  }
  0x1b   : > { %s275_s8 = sshll.u32 %s3111_s30, 4  ;;  %s2263_s9 = sadd.s32 4294967294, %s3103_s26   ;;  %s276_s8 = int_to_ptr.vmem [resolvable:$true] %s275_s8 }
  0x1c   : > { %s38_s11 = sadd.s32 1, %s3099_s25  ;;  %s45_s12 = sadd.s32 1, %s3091_s23 }
  0x1d   : > { %p40_p7 = scmp.ge.s32.totalorder %s38_s11, 2  ;;  %p52_p8 = scmp.ne.s32.totalorder %s3091_s23, %s3087_s22 }
  0x1e   : > { %p53_p9 = scmp.eq.s32.totalorder %s3103_s26, 0  ;;  %p58_p10 = scmp.ne.s32.totalorder %s3087_s22, %s3083_s21 }
  0x1f   : > { %s3797_s11 = smov (%p40_p7, %s38_s11), 0  ;;  %p214_p13 = scmp.eq.s32.totalorder %s3180_s27, 1 }
  0x20   : > { %s273_s29 = sshll.u32 %s3783_s4, 4  ;;  %3784 = sst [smem:[#allocation19_spill]] %s3797_s11  ;;  %s274_s29 = int_to_ptr.hbm [resolvable:$true] %s273_s29 }
  0x21   : > { %2686 = dma.hbm_to_vmem [thread:$0]  (!%p3196_p5), %s274_s29, 256, %s276_s8, [#allocation9], %s3109_s18, %s3109_s18, %s3110_s19  }
  0x22   : > { %p3223_p11 = por %p53_p9, %p52_p8  ;;  %p3229_p12 = por %p59_p1, %p58_p10 }
  0x23   : > { %s42_s14 = ssub.s32 %s3099_s25, %s3797_s11  ;;  %p220_p2 = scmp.eq.s32.totalorder %s2263_s9, 1 }
  0x24   : > { %p43_p0 = scmp.eq.s32.totalorder %s42_s14, 0  ;;  %p3236_p4 = por %p214_p13, %p52_p8 }
  0x25   : > { %p2701_p5 = scmp.lt.s32.totalorder %s3103_s26, 2  ;;  %p3244_p7 = por %p220_p2, %p58_p10 }
  0x26   : > { %s3242_s16 = scalar_select %p43_p0, %s3091_s23, %s45_s12  }
  0x27   : > { %s295_s18 = sand.u32 1, %s3091_s23   ;;  %s2271_s20 = sshll.u32 %s3099_s25, 2 }
  0x28   : > { %3788 = sst [smem:[#allocation20_spill]] %s3242_s16  ;;  %s2270_s19 = sshll.u32 %s295_s18, 2 }
  0x29   : > { %s303_s30 = scalar_lea.hbm %s3764_s0, %s2271_s20  ;;  %s299_s8 = scalar_lea.vmem [#allocation2], %s2270_s19 }
  0x2a   : > { %s307_s9 = sshll.u32 %s299_s8, 4  ;;  %s305_s14 = sshll.u32 %s303_s30, 4  ;;  %s308_s9 = int_to_ptr.vmem [resolvable:$true] %s307_s9  ;;  %s306_s14 = int_to_ptr.hbm [resolvable:$true] %s305_s14 }
  0x2b   : > { %p2688_p8 = pnand %p2701_p5, %p3223_p11  ;;  %s322_s3 = scalar_lea.hbm %s3765_s1, %s2271_s20 }
  0x2c   : > { %s314_s4 = sand.u32 1, %s3103_s26   ;;  %s296_s11 = scalar_lea.sflag [#allocation3], %s295_s18 }
  0x2d   : > { %2690 = dma.hbm_to_vmem [thread:$0]  (!%p2688_p8), %s306_s14, 64, %s308_s9, %s296_s11  }
  0x2e   : > { %s324_s16 = sshll.u32 %s322_s3, 4  ;;  %s318_s25 = scalar_lea.vmem [#allocation5], %s2270_s19  ;;  %s325_s16 = int_to_ptr.hbm [resolvable:$true] %s324_s16 }
  0x2f   : > { %s326_s23 = sshll.u32 %s318_s25, 4  ;;  %s315_s28 = scalar_lea.sflag [#allocation6], %s314_s4  ;;  %s327_s23 = int_to_ptr.vmem [resolvable:$true] %s326_s23 }
  0x30   : > { %2693 = dma.hbm_to_vmem [thread:$0]  (!%p2688_p8), %s325_s16, 64, %s327_s23, %s315_s28  }
  0x31   : > { %335 = sbr.rel (%p3188_p3) target bundleno = 364 (0x16c), region = 44  ;;  %s3262_s13 = sand.u32 (!%p3188_p3), 1, %s3087_s22  }
  0x32   : > { %s2275_s2 = sshll.u32 (!%p3188_p3), %s3262_s13, 2  ;;  %s338_s20 = scalar_lea.sflag (!%p3188_p3), [#allocation3], %s3262_s13 }
  0x33   : > { %s3266_s18 = scalar_lea.vmem (!%p3188_p3), [#allocation2], %s2275_s2 }
  0x36   : > { %3062 = dma.done.wait (%p3229_p12), %s338_s20, 64  }
  0x37   : > { %3064 = vsyncadd (%p3229_p12), %s338_s20, 4294967232  ;;  %s347_s3 = sand.u32 1, %s3180_s27   ;;  %s3273_s23 = scalar_lea.vmem [#allocation5], %s2275_s2 }
  0x38   : > { %s348_s4 = scalar_lea.sflag [#allocation6], %s347_s3 }
  0x39   : > { %3066 = dma.done.wait (%p3229_p12), %s348_s4, 64  }
  0x3a   : > { %3068 = vsyncadd (%p3229_p12), %s348_s4, 4294967232 }
  0x3b   : > { %3070 = dma.done.wait (%p59_p1), [#allocation6], 8192  }
  0x3c   : > { %3072 = vsyncadd (%p59_p1), [#allocation6], 4294959104 }
  0x3d   : > { %3074 = dma.done.wait (%p59_p1), [#allocation9], 512  }
  0x3e   : > { %3076 = vsyncadd (%p59_p1), [#allocation9], 4294966784  ;;  %v1666_v0 = vlaneseq  ;;  %vm795_vm0 = vcmask 261120   ;;  %v2411_v3 = vld [vmem:[#allocation7 + $0x100] sm:$0xf]  ;;  %vm1216_vm1 = vcmask 1047556  }
  0x3f   : > { %v2639_v4 = vld [vmem:[#allocation7 + $0x17c] sm:$0xf0]  ;;  %v2623_v5 = vld [vmem:[#allocation7 + $0x104] sm:$0xf]  ;;  %v2419_v8 = vld [vmem:[#allocation7 + $0x108] sm:$0xf] }
  0x40   : > { %v3287_v1 = vshrl.u32 %v1666_v0, 7  ;;  %v2412_v6 = vor.u32 %v2639_v4, %v2411_v3  ;;  %v2413_v7 = vld [vmem:[#allocation7 + $0x180] sm:$0xf0]  ;;  %v2640_v9 = vld [vmem:[#allocation7 + $0x184] sm:$0xf0]  ;;  %vm2075_vm2 = vcmask 1041409  }
  0x41   : > { %v2416_v10 = vor.u32 %v2623_v5, %v2413_v7  ;;  %v2420_v11 = vor.u32 %v2640_v9, %v2419_v8  ;;  %v2624_v12 = vld [vmem:[#allocation7 + $0x10c] sm:$0xf]  ;;  %v2283_v14 = vld [vmem:[#allocation7] sm:$0xf]  ;;  %v2591_v17 = vld [vmem:[#allocation7 + $0x4] sm:$0xf] }
  0x42   : > { %2769 = vset.pattern.permute.xlu2 %v3287_v1  ;;  %v3291_v2 = vadd.s32 16, %v3287_v1  ;;  %2763 = vset.pattern.permute.xlu0 %v3287_v1  ;;  %v2421_v13 = vld [vmem:[#allocation7 + $0x188] sm:$0xf0]  ;;  %v2607_v16 = vld [vmem:[#allocation7 + $0x7c] sm:$0xf0]  ;;  %s2280_s7 = sshll.u32 %s3262_s13, 3 }
  0x43   : > { %805 = vmatpush.bf16.msra.mxu0 %v2412_v6  ;;  %v2424_v15 = vor.u32 %v2624_v12, %v2421_v13  ;;  %v2285_v18 = vld [vmem:[#allocation7 + $0x80] sm:$0xf0]  ;;  %818 = vmatpush.bf16.msra.mxu1 %v2416_v10  ;;  %v2284_v19 = vor.u32 %v2607_v16, %v2283_v14  ;;  %v2291_v21 = vld [vmem:[#allocation7 + $0x8] sm:$0xf]  ;;  %v2592_v23 = vld [vmem:[#allocation7 + $0xc] sm:$0xf] }
  0x44   : > { %2775 = vset.pattern.permute.xlu1 %v3291_v2  ;;  %831 = vmatpush.bf16.msra.mxu2 %v2420_v11  ;;  %v2288_v20 = vor.u32 %v2591_v17, %v2285_v18  ;;  %v2608_v22 = vld [vmem:[#allocation7 + $0x84] sm:$0xf0]  ;;  %v2293_v25 = vld [vmem:[#allocation7 + $0x88] sm:$0xf0]  ;;  %v2435_v26 = vld [vmem:[#allocation7 + $0x118] sm:$0xf] }
  0x45   : > { %844 = vmatpush.bf16.msra.mxu3 %v2424_v15  ;;  %v2292_v24 = vor.u32 %v2608_v22, %v2291_v21  ;;  %v2642_v27 = vld [vmem:[#allocation7 + $0x194] sm:$0xf0]  ;;  %v2296_v28 = vor.u32 %v2592_v23, %v2293_v25  ;;  %v3299_v31 = vld [vmem:[%s3266_s18] sm:$0xf]  ;;  %v2626_v32 = vld [vmem:[#allocation7 + $0x11c] sm:$0xf] }
  0x46   : > { %v2436_v29 = vor.u32 %v2642_v27, %v2435_v26  ;;  %v3296_v30 = vld [vmem:[%s3273_s23] sm:$0xf]  ;;  %v2427_v35 = vld [vmem:[#allocation7 + $0x110] sm:$0xf]  ;;  %v2625_v39 = vld [vmem:[#allocation7 + $0x114] sm:$0xf] }
  0x47   : > { %806 = vmatpush.bf16.msra.mxu0 %v2284_v19  ;;  %v3302_v33 = vunpack.c.l.bf16 %v3296_v30  ;;  %v2437_v34 = vld [vmem:[#allocation7 + $0x198] sm:$0xf0]  ;;  %v2641_v36 = vld [vmem:[#allocation7 + $0x18c] sm:$0xf0]  ;;  %819 = vmatpush.bf16.msra.mxu1 %v2288_v20  ;;  %v2429_v40 = vld [vmem:[#allocation7 + $0x190] sm:$0xf0] }
  0x48   : > { %832 = vmatpush.bf16.msra.mxu2 %v2292_v24  ;;  %v2440_v37 = vor.u32 %v2626_v32, %v2437_v34  ;;  %v2428_v38 = vor.u32 %v2641_v36, %v2427_v35  ;;  %v2307_v41 = vld [vmem:[#allocation7 + $0x18] sm:$0xf]  ;;  %v2432_v44 = vor.u32 %v2625_v39, %v2429_v40  ;;  %v2594_v46 = vld [vmem:[#allocation7 + $0x1c] sm:$0xf]  ;;  %v2299_v49 = vld [vmem:[#allocation7 + $0x10] sm:$0xf] }
  0x49   : > { %845 = vmatpush.bf16.msra.mxu3 %v2296_v28  ;;  %v1715_v42 = vperm.slane %v3302_v33, 2  ;;  %v1740_v43 = vperm.slane %v3302_v33, 3  ;;  %v2610_v45 = vld [vmem:[#allocation7 + $0x94] sm:$0xf0]  ;;  %v2309_v48 = vld [vmem:[#allocation7 + $0x98] sm:$0xf0] }
  0x4a   : > { %2537 = vmatmul.msk.bf16.vlgmr.msra.gmra.mxu0 %vm795_vm0, %v3299_v31  ;;  %v2308_v47 = vor.u32 %v2610_v45, %v2307_v41  ;;  %v2609_v50 = vld [vmem:[#allocation7 + $0x8c] sm:$0xf0]  ;;  %2538 = vmatmul.msk.bf16.vlgmr.msra.gmra.mxu1 %vm795_vm0, %v3299_v31  ;;  %v2312_v52 = vor.u32 %v2594_v46, %v2309_v48  ;;  %v2593_v53 = vld [vmem:[#allocation7 + $0x14] sm:$0xf]  ;;  %v2451_v55 = vld [vmem:[#allocation7 + $0x128] sm:$0xf] }
  0x4b   : > { %v3308_v51 = vpack.i.bf16 %v1740_v43, %v1715_v42  ;;  %2539 = vmatmul.msk.bf16.vlgmr.msra.gmra.mxu2 %vm795_vm0, %v3299_v31  ;;  %v2301_v54 = vld [vmem:[#allocation7 + $0x90] sm:$0xf0]  ;;  %857 = vmatpush.bf16.msrb.mxu0 %v2428_v38  ;;  %v2300_v56 = vor.u32 %v2609_v50, %v2299_v49  ;;  %v2644_v58 = vld [vmem:[#allocation7 + $0x1a4] sm:$0xf0]  ;;  %v2628_v59 = vld [vmem:[#allocation7 + $0x12c] sm:$0xf] }
  0x4c   : > { %883 = vmatpush.bf16.msrb.mxu2 %v2436_v29  ;;  %2540 = vmatmul.msk.bf16.vlgmr.msra.gmra.mxu3 %vm795_vm0, %v3299_v31  ;;  %v2304_v57 = vor.u32 %v2593_v53, %v2301_v54  ;;  %v2453_v60 = vld [vmem:[#allocation7 + $0x1a8] sm:$0xf0]  ;;  %v2452_v61 = vor.u32 %v2644_v58, %v2451_v55  ;;  %v1665_v63 = vperm.slane %v3302_v33, 0  ;;  %v1690_v0 = vperm.slane %v3302_v33, 1  ;;  %v2443_v3 = vld [vmem:[#allocation7 + $0x120] sm:$0xf] }
  0x4d   : > { %896 = vmatpush.bf16.msrb.mxu3 %v2440_v37  ;;  %2771 = vperm.xlu2 %2769, %v3308_v51   ;;  %v2456_v62 = vor.u32 %v2628_v59, %v2453_v60  ;;  %v2643_v4 = vld [vmem:[#allocation7 + $0x19c] sm:$0xf0]  ;;  %v2627_v6 = vld [vmem:[#allocation7 + $0x124] sm:$0xf]  ;;  %v2323_v8 = vld [vmem:[#allocation7 + $0x28] sm:$0xf] }
  0x4e   : > { %870 = vmatpush.bf16.msrb.mxu1 %v2432_v44  ;;  %v2444_v5 = vor.u32 %v2643_v4, %v2443_v3  ;;  %v2445_v7 = vld [vmem:[#allocation7 + $0x1a0] sm:$0xf0]  ;;  %v3319_v9 = vpack.i.bf16 %v1690_v0, %v1665_v63  ;;  %v2612_v11 = vld [vmem:[#allocation7 + $0xa4] sm:$0xf0]  ;;  %v2596_v12 = vld [vmem:[#allocation7 + $0x2c] sm:$0xf] }
  0x4f   : > { %v2448_v10 = vor.u32 %v2627_v6, %v2445_v7  ;;  %v2325_v13 = vld [vmem:[#allocation7 + $0xa8] sm:$0xf0]  ;;  %858 = vmatpush.bf16.msrb.mxu0 %v2300_v56  ;;  %v2324_v14 = vor.u32 %v2612_v11, %v2323_v8  ;;  %v2315_v16 = vld [vmem:[#allocation7 + $0x20] sm:$0xf]  ;;  %v2595_v18 = vld [vmem:[#allocation7 + $0x24] sm:$0xf] }
  0x50   : > { %884 = vmatpush.bf16.msrb.mxu2 %v2308_v47  ;;  %v2328_v15 = vor.u32 %v2596_v12, %v2325_v13  ;;  %v2611_v17 = vld [vmem:[#allocation7 + $0x9c] sm:$0xf0]  ;;  %v3322_v19 = vadd.s32 8, %v3287_v1  ;;  %2777 = vperm.xlu1 %2775, %v3319_v9   ;;  %v2317_v20 = vld [vmem:[#allocation7 + $0xa0] sm:$0xf0]  ;;  %v1765_v27 = vperm.slane %v3302_v33, 4 }
  0x51   : > { %897 = vmatpush.bf16.msrb.mxu3 %v2312_v52  ;;  %v2316_v21 = vor.u32 %v2611_v17, %v2315_v16  ;;  %v2320_v22 = vor.u32 %v2595_v18, %v2317_v20  ;;  %2765 = vperm.xlu0 %2763, %v3319_v9   ;;  %v2467_v23 = vld [vmem:[#allocation7 + $0x138] sm:$0xf]  ;;  %v2630_v25 = vld [vmem:[#allocation7 + $0x13c] sm:$0xf]  ;;  %v1790_v28 = vperm.slane %v3302_v33, 5  ;;  %v3330_v29 = vadd.s32 24, %v3287_v1 }
  0x52   : > { %871 = vmatpush.bf16.msrb.mxu1 %v2304_v57  ;;  %v2646_v24 = vld [vmem:[#allocation7 + $0x1b4] sm:$0xf0]  ;;  %v2469_v26 = vld [vmem:[#allocation7 + $0x1b8] sm:$0xf0]  ;;  %v2459_v32 = vld [vmem:[#allocation7 + $0x130] sm:$0xf] }
  0x53   : > { %909 = vmatpush.bf16.msra.mxu0 %v2444_v5  ;;  %v2645_v34 = vld [vmem:[#allocation7 + $0x1ac] sm:$0xf0]  ;;  %v2468_v35 = vor.u32 %v2646_v24, %v2467_v23  ;;  %v2629_v36 = vld [vmem:[#allocation7 + $0x134] sm:$0xf]  ;;  %v2472_v38 = vor.u32 %v2630_v25, %v2469_v26  ;;  %v2339_v39 = vld [vmem:[#allocation7 + $0x38] sm:$0xf]  ;;  %v3335_v41 = vpack.i.bf16 %v1790_v28, %v1765_v27 }
  0x54   : > { %935 = vmatpush.bf16.msra.mxu2 %v2452_v61  ;;  %v2461_v37 = vld [vmem:[#allocation7 + $0x1b0] sm:$0xf0]  ;;  %v2614_v40 = vld [vmem:[#allocation7 + $0xb4] sm:$0xf0]  ;;  %v2460_v42 = vor.u32 %v2645_v34, %v2459_v32  ;;  %v2598_v43 = vld [vmem:[#allocation7 + $0x3c] sm:$0xf] }
  0x55   : > { %948 = vmatpush.bf16.msra.mxu3 %v2456_v62  ;;  %2787 = vset.pattern.permute.xlu2 %v3322_v19  ;;  %v2341_v44 = vld [vmem:[#allocation7 + $0xb8] sm:$0xf0]  ;;  %v2464_v45 = vor.u32 %v2629_v36, %v2461_v37  ;;  %v2331_v46 = vld [vmem:[#allocation7 + $0x30] sm:$0xf]  ;;  %v2340_v48 = vor.u32 %v2614_v40, %v2339_v39  ;;  %v2597_v49 = vld [vmem:[#allocation7 + $0x34] sm:$0xf] }
  0x56   : > { %922 = vmatpush.bf16.msra.mxu1 %v2448_v10  ;;  %v2613_v47 = vld [vmem:[#allocation7 + $0xac] sm:$0xf0]  ;;  %v2333_v50 = vld [vmem:[#allocation7 + $0xb0] sm:$0xf0]  ;;  %v2344_v52 = vor.u32 %v2598_v43, %v2341_v44  ;;  %v2483_v55 = vld [vmem:[#allocation7 + $0x148] sm:$0xf] }
  0x57   : > { %910 = vmatpush.bf16.msra.mxu0 %v2316_v21  ;;  %v2332_v53 = vor.u32 %v2613_v47, %v2331_v46  ;;  %v2336_v54 = vor.u32 %v2597_v49, %v2333_v50  ;;  %v2648_v56 = vld [vmem:[#allocation7 + $0x1c4] sm:$0xf0]  ;;  %v2632_v57 = vld [vmem:[#allocation7 + $0x14c] sm:$0xf]  ;;  %v2475_v59 = vld [vmem:[#allocation7 + $0x140] sm:$0xf] }
  0x58   : > { %936 = vmatpush.bf16.msra.mxu2 %v2324_v14  ;;  %2781 = vset.pattern.permute.xlu1 %v3330_v29  ;;  %v2485_v58 = vld [vmem:[#allocation7 + $0x1c8] sm:$0xf0]  ;;  %v2647_v60 = vld [vmem:[#allocation7 + $0x1bc] sm:$0xf0]  ;;  %v2631_v61 = vld [vmem:[#allocation7 + $0x144] sm:$0xf]  ;;  %v2484_v63 = vor.u32 %v2648_v56, %v2483_v55 }
  0x59   : > { %949 = vmatpush.bf16.msra.mxu3 %v2328_v15  ;;  %2806 = vperm.xlu0 %2763, %v3335_v41   ;;  %v2477_v62 = vld [vmem:[#allocation7 + $0x1c0] sm:$0xf0]  ;;  %v2488_v0 = vor.u32 %v2632_v57, %v2485_v58  ;;  %v2355_v3 = vld [vmem:[#allocation7 + $0x48] sm:$0xf]  ;;  %v2476_v5 = vor.u32 %v2647_v60, %v2475_v59  ;;  %v2600_v7 = vld [vmem:[#allocation7 + $0x4c] sm:$0xf] }
  0x5a   : > { %923 = vmatpush.bf16.msra.mxu1 %v2320_v22  ;;  %2541 = vmatmul.msk.bf16.vlgmr.msrb.gmra.mxu0 %vm795_vm0, %v3299_v31  ;;  %v2616_v4 = vld [vmem:[#allocation7 + $0xc4] sm:$0xf0]  ;;  %v2480_v6 = vor.u32 %v2631_v61, %v2477_v62  ;;  %v2357_v8 = vld [vmem:[#allocation7 + $0xc8] sm:$0xf0]  ;;  %v2347_v10 = vld [vmem:[#allocation7 + $0x40] sm:$0xf] }
  0x5b   : > { %2542 = vmatmul.msk.bf16.vlgmr.msrb.gmra.mxu1 %vm795_vm0, %v3299_v31  ;;  %2543 = vmatmul.msk.bf16.vlgmr.msrb.gmra.mxu2 %vm795_vm0, %v3299_v31  ;;  %v2615_v11 = vld [vmem:[#allocation7 + $0xbc] sm:$0xf0]  ;;  %v2599_v12 = vld [vmem:[#allocation7 + $0x44] sm:$0xf]  ;;  %v2356_v14 = vor.u32 %v2616_v4, %v2355_v3  ;;  %v2360_v15 = vor.u32 %v2600_v7, %v2357_v8  ;;  %v1815_v18 = vperm.slane %v3302_v33, 6  ;;  %v1840_v20 = vperm.slane %v3302_v33, 7 }
  0x5c   : > { %2544 = vmatmul.msk.bf16.vlgmr.msrb.gmra.mxu3 %vm795_vm0, %v3299_v31  ;;  %987 = vmatpush.bf16.msrb.mxu2 %v2468_v35  ;;  %v2349_v13 = vld [vmem:[#allocation7 + $0xc0] sm:$0xf0]  ;;  %v2348_v16 = vor.u32 %v2615_v11, %v2347_v10  ;;  %v2499_v22 = vld [vmem:[#allocation7 + $0x158] sm:$0xf]  ;;  %v2634_v24 = vld [vmem:[#allocation7 + $0x15c] sm:$0xf] }
  0x5d   : > { %2789 = vperm.xlu2 %2787, %v3308_v51   ;;  %1000 = vmatpush.bf16.msrb.mxu3 %v2472_v38  ;;  %v2352_v17 = vor.u32 %v2599_v12, %v2349_v13  ;;  %v3362_v21 = vpack.i.bf16 %v1840_v20, %v1815_v18  ;;  %v2650_v23 = vld [vmem:[#allocation7 + $0x1d4] sm:$0xf0]  ;;  %v2501_v25 = vld [vmem:[#allocation7 + $0x1d8] sm:$0xf0]  ;;  %v2491_v26 = vld [vmem:[#allocation7 + $0x150] sm:$0xf] }
  0x5e   : > { %961 = vmatpush.bf16.msrb.mxu0 %v2460_v42  ;;  %974 = vmatpush.bf16.msrb.mxu1 %v2464_v45  ;;  %v2493_v27 = vld [vmem:[#allocation7 + $0x1d0] sm:$0xf0]  ;;  %v2500_v28 = vor.u32 %v2650_v23, %v2499_v22  ;;  %v2504_v33 = vor.u32 %v2634_v24, %v2501_v25  ;;  %v2371_v32 = vld [vmem:[#allocation7 + $0x58] sm:$0xf]  ;;  %v2602_v37 = vld [vmem:[#allocation7 + $0x5c] sm:$0xf] }
  0x5f   : > { %v2618_v34 = vld [vmem:[#allocation7 + $0xd4] sm:$0xf0]  ;;  %v2373_v38 = vld [vmem:[#allocation7 + $0xd8] sm:$0xf0]  ;;  %v2363_v39 = vld [vmem:[#allocation7 + $0x50] sm:$0xf] }
  0x60   : > { %988 = vmatpush.bf16.msrb.mxu2 %v2340_v48  ;;  %2783 = vperm.xlu1 %2781, %v3319_v9   ;;  %v2617_v40 = vld [vmem:[#allocation7 + $0xcc] sm:$0xf0]  ;;  %v2601_v42 = vld [vmem:[#allocation7 + $0x54] sm:$0xf]  ;;  %v2372_v43 = vor.u32 %v2618_v34, %v2371_v32  ;;  %v2376_v44 = vor.u32 %v2602_v37, %v2373_v38  ;;  %v2515_v47 = vld [vmem:[#allocation7 + $0x168] sm:$0xf] }
  0x61   : > { %1001 = vmatpush.bf16.msrb.mxu3 %v2344_v52  ;;  %2810 = vset.pattern.permute.xlu0 %v3322_v19  ;;  %v2364_v45 = vor.u32 %v2617_v40, %v2363_v39  ;;  %v2652_v48 = vld [vmem:[#allocation7 + $0x1e4] sm:$0xf0]  ;;  %v2636_v49 = vld [vmem:[#allocation7 + $0x16c] sm:$0xf]  ;;  %v2507_v52 = vld [vmem:[#allocation7 + $0x160] sm:$0xf] }
  0x62   : > { %962 = vmatpush.bf16.msrb.mxu0 %v2332_v53  ;;  %975 = vmatpush.bf16.msrb.mxu1 %v2336_v54  ;;  %v2517_v50 = vld [vmem:[#allocation7 + $0x1e8] sm:$0xf0]  ;;  %v2651_v53 = vld [vmem:[#allocation7 + $0x1dc] sm:$0xf0]  ;;  %v2635_v54 = vld [vmem:[#allocation7 + $0x164] sm:$0xf]  ;;  %v2516_v56 = vor.u32 %v2652_v48, %v2515_v47 }
  0x63   : > { %v2509_v55 = vld [vmem:[#allocation7 + $0x1e0] sm:$0xf0]  ;;  %v2520_v57 = vor.u32 %v2636_v49, %v2517_v50  ;;  %v2387_v58 = vld [vmem:[#allocation7 + $0x68] sm:$0xf]  ;;  %v2508_v60 = vor.u32 %v2651_v53, %v2507_v52  ;;  %v2389_v62 = vld [vmem:[#allocation7 + $0xe8] sm:$0xf0] }
  0x64   : > { %v2620_v59 = vld [vmem:[#allocation7 + $0xe4] sm:$0xf0]  ;;  %v2512_v61 = vor.u32 %v2635_v54, %v2509_v55  ;;  %v2603_v3 = vld [vmem:[#allocation7 + $0x64] sm:$0xf]  ;;  %v2531_v10 = vld [vmem:[#allocation7 + $0x178] sm:$0xf] }
  0x65   : > { %2799 = vset.pattern.permute.xlu2 %v3330_v29  ;;  %v2381_v4 = vld [vmem:[#allocation7 + $0xe0] sm:$0xf0]  ;;  %v2654_v11 = vld [vmem:[#allocation7 + $0x1f4] sm:$0xf0]  ;;  %v2638_v12 = vld [vmem:[#allocation7 + $0x17c] sm:$0xf] }
  0x66   : > { %v2384_v8 = vor.u32 %v2603_v3, %v2381_v4  ;;  %v2533_v13 = vld [vmem:[#allocation7 + $0x1f8] sm:$0xf0]  ;;  %v2532_v18 = vor.u32 %v2654_v11, %v2531_v10  ;;  %v2403_v23 = vld [vmem:[#allocation7 + $0x78] sm:$0xf]  ;;  %v2655_v37 = vld [vmem:[#allocation8] sm:$0xff]  ;;  %s2588_s11 = sshll.u32 %s3095_s24, 3 }
  0x67   : > { %v2536_v20 = vor.u32 %v2638_v12, %v2533_v13  ;;  %v2606_v25 = vld [vmem:[#allocation7 + $0x7c] sm:$0xf]  ;;  %v3112_v40 = vmov 1983009808   ;;  %vm2078_vm3 = vcmask 1042434   ;;  %vm2081_vm4 = vcmask 1043459   ;;  %s2109_s19 = scalar_lea.hbm %s3770_s6, %s2588_s11 }
  0x68   : > { %2793 = vset.pattern.permute.xlu1 %v3291_v2  ;;  %v2658_v34 = vld [vmem:[#allocation10 + $0x8] sm:$0xff]  ;;  %vm2084_vm5 = vcmask 1044484   ;;  %vm2087_vm6 = vcmask 1045509   ;;  %vm2090_vm7 = vcmask 1046534   ;;  %s403_s24 = scalar_lea.vmem [#allocation11], %s2280_s7  ;;  %s2113_s30 = sshll.u32 %s2109_s19, 4  ;;  %s2114_s30 = int_to_ptr.hbm [resolvable:$true] %s2113_s30 }
  0x69   : > { %2812 = vperm.xlu0 %2810, %v3319_v9   ;;  %v2649_v9 = vld [vmem:[#allocation7 + $0x1cc] sm:$0xf0]  ;;  %s2111_s29 = sshll.u32 %s403_s24, 4  ;;  %vm2093_vm8 = vcmask 1047559   ;;  %s2098_s8 = scalar_lea.sflag [#allocation4], %s3262_s13  ;;  %s2112_s29 = int_to_ptr.vmem [resolvable:$true] %s2111_s29 }
  0x6a   : > { %2545 = vmatmul.msk.bf16.vlgmr.msra.gmra.mxu0 %vm795_vm0, %v3299_v31  ;;  %v2492_v35 = vor.u32 %v2649_v9, %v2491_v26  ;;  %v2405_v26 = vld [vmem:[#allocation7 + $0xf8] sm:$0xf0]  ;;  %v2395_v9 = vld [vmem:[#allocation7 + $0x70] sm:$0xf]  ;;  %s3023_s9 = sshra.s32 %s2114_s30, 4  ;;  %s3029_s2 = scalar_lea.hbm %s3770_s6, 16  ;;  %s3024_s9 = int_to_ptr.hbm [resolvable:$true] %s3023_s9 }
  0x6b   : > { %2546 = vmatmul.msk.bf16.vlgmr.msra.gmra.mxu1 %vm795_vm0, %v3299_v31  ;;  %2547 = vmatmul.msk.bf16.vlgmr.msra.gmra.mxu2 %vm795_vm0, %v3299_v31  ;;  %s3025_s14 = scalar_lea.hbm %s3024_s9, 8  ;;  %p3030_p10 = scmp.lt.s32.totalorder %s3024_s9, %s3770_s6 }
  0x6c   : > { %2548 = vmatmul.msk.bf16.vlgmr.msra.gmra.mxu3 %vm795_vm0, %v3299_v31  ;;  %1039 = vmatpush.bf16.msra.mxu2 %v2484_v63  ;;  %v2379_v63 = vld [vmem:[#allocation7 + $0x60] sm:$0xf]  ;;  %p3026_p1 = scmp.ne.s32.totalorder %s3024_s9, %s3025_s14  ;;  %p3031_p11 = scmp.lt.s32.totalorder %s3029_s2, %s3025_s14 }
  0x6d   : > { %2801 = vperm.xlu2 %2799, %v3308_v51   ;;  %1052 = vmatpush.bf16.msra.mxu3 %v2488_v0  ;;  %v2619_v0 = vld [vmem:[#allocation7 + $0xdc] sm:$0xf0] }
  0x6e   : > { %1013 = vmatpush.bf16.msra.mxu0 %v2476_v5  ;;  %1026 = vmatpush.bf16.msra.mxu1 %v2480_v6  ;;  %v2388_v5 = vor.u32 %v2620_v59, %v2387_v58  ;;  %v2380_v7 = vor.u32 %v2619_v0, %v2379_v63  ;;  %p3027_p3 = pnand %p3026_p1, %p3236_p4  ;;  %p3032_p12 = por %p3031_p11, %p3030_p10 }
  0x70   : > { %1040 = vmatpush.bf16.msra.mxu2 %v2356_v14  ;;  %2795 = vperm.xlu1 %2793, %v3308_v51   ;;  %v2633_v51 = vld [vmem:[#allocation7 + $0x154] sm:$0xf]  ;;  %v2523_v14 = vld [vmem:[#allocation7 + $0x170] sm:$0xf]  ;;  %p3028_p9 = pneg %p3027_p3 }
  0x71   : > { %1053 = vmatpush.bf16.msra.mxu3 %v2360_v15  ;;  %2841 = vperm.xlu0 %2810, %v3362_v21   ;;  %v2496_v36 = vor.u32 %v2633_v51, %v2493_v27  ;;  %v2653_v15 = vld [vmem:[#allocation7 + $0x1ec] sm:$0xf0]  ;;  %v2605_v51 = vld [vmem:[#allocation7 + $0x74] sm:$0xf] }
  0x72   : > { %1014 = vmatpush.bf16.msra.mxu0 %v2348_v16  ;;  %1027 = vmatpush.bf16.msra.mxu1 %v2352_v17  ;;  %v2637_v16 = vld [vmem:[#allocation7 + $0x174] sm:$0xf]  ;;  %v2524_v22 = vor.u32 %v2653_v15, %v2523_v14  ;;  %p3033_p13 = pnand %p3032_p12, %p3028_p9 }
  0x73   : > { %v2525_v17 = vld [vmem:[#allocation7 + $0x1f0] sm:$0xf0] }
  0x74   : > { %v2528_v24 = vor.u32 %v2637_v16, %v2525_v17 }
  0x75   : > { %2822 = vset.pattern.permute.xlu2 %v3291_v2 }
  0x78   : > { %2816 = vset.pattern.permute.xlu1 %v3322_v19  ;;  %v2365_v19 = vld [vmem:[#allocation7 + $0xd0] sm:$0xf0] }
  0x79   : > { %v2368_v46 = vor.u32 %v2601_v42, %v2365_v19  ;;  %2857 = vset.pattern.permute.xlu0 %v3330_v29  ;;  %v1221_v42 = vunpack.c.l.s4 %v3112_v40 }
  0x7a   : > { %2549 = vmatmul.msk.bf16.vlgmr.msrb.gmra.mxu0 %vm795_vm0, %v3299_v31 }
  0x7b   : > { %2550 = vmatmul.msk.bf16.vlgmr.msrb.gmra.mxu1 %vm795_vm0, %v3299_v31  ;;  %2551 = vmatmul.msk.bf16.vlgmr.msrb.gmra.mxu2 %vm795_vm0, %v3299_v31 }
  0x7c   : > { %2552 = vmatmul.msk.bf16.vlgmr.msrb.gmra.mxu3 %vm795_vm0, %v3299_v31  ;;  %1091 = vmatpush.bf16.msrb.mxu2 %v2500_v28  ;;  %v2408_v28 = vor.u32 %v2606_v25, %v2405_v26 }
  0x7d   : > { %2824 = vperm.xlu2 %2822, %v3335_v41   ;;  %1104 = vmatpush.bf16.msrb.mxu3 %v2504_v33 }
  0x7e   : > { %1065 = vmatpush.bf16.msrb.mxu0 %v2492_v35  ;;  %1078 = vmatpush.bf16.msrb.mxu1 %v2496_v36  ;;  %v2656_v35 = vld [vmem:[#allocation8 + $0x8] sm:$0xff]  ;;  %v2657_v36 = vld [vmem:[#allocation10] sm:$0xff] }
  0x80   : > { %1092 = vmatpush.bf16.msrb.mxu2 %v2372_v43  ;;  %2818 = vperm.xlu1 %2816, %v3335_v41  }
  0x81   : > { %1105 = vmatpush.bf16.msrb.mxu3 %v2376_v44  ;;  %v3421_v44 = vunpack.c.0.s8 %v1221_v42 }
  0x82   : > { %1066 = vmatpush.bf16.msrb.mxu0 %v2364_v45  ;;  %1079 = vmatpush.bf16.msrb.mxu1 %v2368_v46 }
  0x85   : > { %2834 = vset.pattern.permute.xlu2 %v3287_v1  ;;  %v2604_v1 = vld [vmem:[#allocation7 + $0x6c] sm:$0xf] }
  0x86   : > { %v2392_v6 = vor.u32 %v2604_v1, %v2389_v62 }
  0x88   : > { %2828 = vset.pattern.permute.xlu1 %v3330_v29 }
  0x8a   : > { %2553 = vmatmul.msk.bf16.vlgmr.msra.gmra.mxu0 %vm795_vm0, %v3299_v31 }
  0x8b   : > { %2554 = vmatmul.msk.bf16.vlgmr.msra.gmra.mxu1 %vm795_vm0, %v3299_v31  ;;  %2555 = vmatmul.msk.bf16.vlgmr.msra.gmra.mxu2 %vm795_vm0, %v3299_v31 }
  0x8c   : > { %2556 = vmatmul.msk.bf16.vlgmr.msra.gmra.mxu3 %vm795_vm0, %v3299_v31  ;;  %1143 = vmatpush.bf16.msra.mxu2 %v2516_v56 }
  0x8d   : > { %2836 = vperm.xlu2 %2834, %v3362_v21   ;;  %1156 = vmatpush.bf16.msra.mxu3 %v2520_v57 }
  0x8e   : > { %1117 = vmatpush.bf16.msra.mxu0 %v2508_v60  ;;  %1130 = vmatpush.bf16.msra.mxu1 %v2512_v61 }
  0x90   : > { %1144 = vmatpush.bf16.msra.mxu2 %v2388_v5  ;;  %2830 = vperm.xlu1 %2828, %v3335_v41   ;;  %v2622_v41 = vld [vmem:[#allocation7 + $0xf4] sm:$0xf0] }
  0x91   : > { %1157 = vmatpush.bf16.msra.mxu3 %v2392_v6  ;;  %v2404_v27 = vor.u32 %v2622_v41, %v2403_v23 }
  0x92   : > { %1118 = vmatpush.bf16.msra.mxu0 %v2380_v7  ;;  %1131 = vmatpush.bf16.msra.mxu1 %v2384_v8  ;;  %v3113_v8 = vmov 1934713408  }
  0x93   : > { %v1269_v10 = vunpack.c.l.s4 %v3113_v8 }
  0x95   : > { %2851 = vset.pattern.permute.xlu2 %v3330_v29  ;;  %v2621_v29 = vld [vmem:[#allocation7 + $0xec] sm:$0xf0]  ;;  %v3440_v13 = vunpack.c.0.s8 %v1269_v10 }
  0x96   : > { %v2396_v33 = vor.u32 %v2621_v29, %v2395_v9 }
  0x98   : > { %2845 = vset.pattern.permute.xlu1 %v3291_v2  ;;  %v2397_v2 = vld [vmem:[#allocation7 + $0xf0] sm:$0xf0] }
  0x99   : > { %v2400_v32 = vor.u32 %v2605_v51, %v2397_v2 }
  0x9a   : > { %2557 = vmatmul.msk.bf16.vlgmr.msrb.gmra.mxu0 %vm795_vm0, %v3299_v31 }
  0x9b   : > { %2558 = vmatmul.msk.bf16.vlgmr.msrb.gmra.mxu1 %vm795_vm0, %v3299_v31  ;;  %2559 = vmatmul.msk.bf16.vlgmr.msrb.gmra.mxu2 %vm795_vm0, %v3299_v31 }
  0x9c   : > { %2560 = vmatmul.msk.bf16.vlgmr.msrb.gmra.mxu3 %vm795_vm0, %v3299_v31  ;;  %1195 = vmatpush.bf16.msrb.mxu2 %v2532_v18 }
  0x9d   : > { %1208 = vmatpush.bf16.msrb.mxu3 %v2536_v20  ;;  %1169 = vmatpush.bf16.msrb.mxu0 %v2524_v22 }
  0x9e   : > { %1182 = vmatpush.bf16.msrb.mxu1 %v2528_v24  ;;  %2853 = vperm.xlu2 %2851, %v3362_v21  }
  0xa0   : > { %1196 = vmatpush.bf16.msrb.mxu2 %v2404_v27  ;;  %2847 = vperm.xlu1 %2845, %v3362_v21  }
  0xa1   : > { %1209 = vmatpush.bf16.msrb.mxu3 %v2408_v28  ;;  %1170 = vmatpush.bf16.msrb.mxu0 %v2396_v33 }
  0xa2   : > { %1183 = vmatpush.bf16.msrb.mxu1 %v2400_v32 }
  0xa7   : > { %v3423_v45 = vpop.permute.xlu2 %2771 }
  0xaa   : > { %2561 = vmatmul.msk.bf16.vlgmr.msra.gmra.mxu0 %vm795_vm0, %v3299_v31 }
  0xab   : > { %2562 = vmatmul.msk.bf16.vlgmr.msra.gmra.mxu1 %vm795_vm0, %v3299_v31  ;;  %2563 = vmatmul.msk.bf16.vlgmr.msra.gmra.mxu2 %vm795_vm0, %v3299_v31 }
  0xac   : > { %2564 = vmatmul.msk.bf16.vlgmr.msra.gmra.mxu3 %vm795_vm0, %v3299_v31  ;;  %1998 = vmatpush.bf16.msra.mxu0 %v2658_v34 }
  0xad   : > { %2023 = vmatpush.bf16.msra.mxu1 %v2656_v35 }
  0xb0   : > { %1999 = vmatpush.bf16.msra.mxu0 %v2657_v36 }
  0xb1   : > { %2024 = vmatpush.bf16.msra.mxu1 %v2655_v37 }
  0xb7   : > { %v3438_v7 = vpop.permute.xlu2 %2789 }
  0xba   : > { %2565 = vmatmul.msk.bf16.vlgmr.msrb.gmra.mxu0 %vm795_vm0, %v3299_v31 }
  0xbb   : > { %2566 = vmatmul.msk.bf16.vlgmr.msrb.gmra.mxu1 %vm795_vm0, %v3299_v31  ;;  %2567 = vmatmul.msk.bf16.vlgmr.msrb.gmra.mxu2 %vm795_vm0, %v3299_v31 }
  0xbc   : > { %2568 = vmatmul.msk.bf16.vlgmr.msrb.gmra.mxu3 %vm795_vm0, %v3299_v31 }
  0xc2   : > { %v3451_v51 = vpop.permute.xlu1 %2777 }
  0xc3   : > { %v3443_v20 = vpop.permute.xlu0 %2765 }
  0xc7   : > { %v808_v38 = vpop.f32.mrf.mxu0  ;;  %v821_v39 = vpop.f32.mrf.mxu1 }
  0xc8   : > { %v1218_v19 = vrot.slane %v808_v38, 4  ;;  %v1230_v43 = vrot.slane %v821_v39, 4  ;;  %v3456_v32 = vpop.permute.xlu2 %2801 }
  0xca   : > { %2577 = vmatmul.msk.bf16.vlgmr.msra.gmra.mxu0 %vm795_vm0, %v3296_v30 }
  0xcb   : > { %2586 = vmatmul.msk.bf16.vlgmr.msra.gmra.mxu1 %vm795_vm0, %v3299_v31 }
  0xce   : > { %v834_v46 = vpop.f32.mrf.mxu2 }
  0xcf   : > { %v1215_v47 = vrot.slane %v834_v46, 4  ;;  %v1219_v48 = vsel %vm1216_vm1, %v834_v46, %v1218_v19  ;;  %v847_v49 = vpop.f32.mrf.mxu3  ;;  %v810_v50 = vpop.f32.mrf.mxu0 }
  0xd0   : > { %v1227_v30 = vperm.slane %v1219_v48, %v3421_v44  ;;  %v1228_v52 = vrot.slane %v847_v49, 4  ;;  %v1231_v53 = vsel %vm1216_vm1, %v847_v49, %v1230_v43  ;;  %v823_v31 = vpop.f32.mrf.mxu1 }
  0xd1   : > { %v1217_v54 = vsel %vm1216_vm1, %v1215_v47, %v808_v38  ;;  %v1239_v55 = vperm.slane %v1231_v53, %v3421_v44 }
  0xd2   : > { %v1223_v56 = vperm.slane %v1217_v54, %v3421_v44  ;;  %v1278_v57 = vrot.slane %v1227_v30, 4  ;;  %v1229_v58 = vsel %vm1216_vm1, %v1228_v52, %v821_v39 }
  0xd3   : > { %v1235_v59 = vperm.slane %v1229_v58, %v3421_v44  ;;  %v1276_v60 = vrot.slane %v1239_v55, 4 }
  0xd4   : > { %v1266_v61 = vrot.slane %v1223_v56, 4  ;;  %v1279_v21 = vsel %vm1216_vm1, %v1239_v55, %v1278_v57 }
  0xd5   : > { %v1264_v1 = vrot.slane %v1235_v59, 4  ;;  %v1277_v62 = vsel %vm1216_vm1, %v1276_v60, %v1227_v30  ;;  %v1287_v25 = vperm.slane %v1279_v21, %v3440_v13 }
  0xd6   : > { %v1267_v63 = vsel %vm1216_vm1, %v1235_v59, %v1266_v61  ;;  %v836_v0 = vpop.f32.mrf.mxu2  ;;  %v1283_v29 = vperm.slane %v1277_v62, %v3440_v13 }
  0xd7   : > { %v1265_v3 = vsel %vm1216_vm1, %v1264_v1, %v1223_v56  ;;  %v849_v4 = vpop.f32.mrf.mxu3  ;;  %v860_v5 = vpop.f32.mrf.mxu0  ;;  %v1275_v2 = vperm.slane %v1267_v63, %v3440_v13  ;;  %v1326_v19 = vrot.slane %v1287_v25, 4 }
  0xd8   : > { %v873_v6 = vpop.f32.mrf.mxu1  ;;  %v1242_v11 = vrot.slane %v860_v5, 4  ;;  %v1271_v36 = vperm.slane %v1265_v3, %v3440_v13  ;;  %v1322_v48 = vrot.slane %v1283_v29, 4  ;;  %v2807_v63 = vpop.permute.xlu0 %2806 }
  0xd9   : > { %v1254_v12 = vrot.slane %v873_v6, 4  ;;  %v1318_v43 = vrot.slane %v1275_v2, 4  ;;  %v3477_v4 = vpop.permute.xlu1 %2783 }
  0xda   : > { %v1314_v54 = vrot.slane %v1271_v36, 4 }
  0xde   : > { %v886_v14 = vpop.f32.mrf.mxu2 }
  0xdf   : > { %v1240_v15 = vrot.slane %v886_v14, 4  ;;  %v1243_v16 = vsel %vm1216_vm1, %v886_v14, %v1242_v11  ;;  %v899_v17 = vpop.f32.mrf.mxu3  ;;  %v862_v18 = vpop.f32.mrf.mxu0 }
  0xe0   : > { %v1251_v22 = vperm.slane %v1243_v16, %v3421_v44  ;;  %v1252_v23 = vrot.slane %v899_v17, 4  ;;  %v1255_v41 = vsel %vm1216_vm1, %v899_v17, %v1254_v12  ;;  %v875_v24 = vpop.f32.mrf.mxu1 }
  0xe1   : > { %v1241_v26 = vsel %vm1216_vm1, %v1240_v15, %v860_v5  ;;  %v1263_v9 = vperm.slane %v1255_v41, %v3421_v44 }
  0xe2   : > { %v1247_v27 = vperm.slane %v1241_v26, %v3421_v44  ;;  %v1302_v28 = vrot.slane %v1251_v22, 4  ;;  %v1253_v33 = vsel %vm1216_vm1, %v1252_v23, %v873_v6  ;;  %v3480_v6 = vpop.permute.xlu2 %2824 }
  0xe3   : > { %v1259_v34 = vperm.slane %v1253_v33, %v3421_v44  ;;  %v1300_v35 = vrot.slane %v1263_v9, 4 }
  0xe4   : > { %v1290_v37 = vrot.slane %v1247_v27, 4  ;;  %v1303_v38 = vsel %vm1216_vm1, %v1263_v9, %v1302_v28 }
  0xe5   : > { %v1288_v39 = vrot.slane %v1259_v34, 4  ;;  %v1301_v40 = vsel %vm1216_vm1, %v1300_v35, %v1251_v22  ;;  %v1311_v42 = vperm.slane %v1303_v38, %v3440_v13 }
  0xe6   : > { %v1291_v46 = vsel %vm1216_vm1, %v1259_v34, %v1290_v37  ;;  %v1307_v47 = vperm.slane %v1301_v40, %v3440_v13  ;;  %v888_v49 = vpop.f32.mrf.mxu2 }
  0xe7   : > { %v1289_v50 = vsel %vm1216_vm1, %v1288_v39, %v1247_v27  ;;  %v1299_v30 = vperm.slane %v1291_v46, %v3440_v13  ;;  %v1324_v52 = vrot.slane %v1311_v42, 4  ;;  %v3468_v53 = vsel %vm1216_vm1, %v1311_v42, %v1326_v19  ;;  %v901_v31 = vpop.f32.mrf.mxu3  ;;  %v912_v57 = vpop.f32.mrf.mxu0 }
  0xe8   : > { %v1295_v55 = vperm.slane %v1289_v50, %v3440_v13  ;;  %v1320_v56 = vrot.slane %v1307_v47, 4  ;;  %v925_v58 = vpop.f32.mrf.mxu1  ;;  %v1323_v21 = vsel %vm1216_vm1, %v1307_v47, %v1322_v48  ;;  %v1330_v8 = vrot.slane %v912_v57, 4 }
  0xe9   : > { %v1316_v59 = vrot.slane %v1299_v30, 4  ;;  %v1319_v60 = vsel %vm1216_vm1, %v1299_v30, %v1318_v43  ;;  %v1325_v61 = vsel %vm1216_vm1, %v1324_v52, %v1287_v25  ;;  %v1342_v10 = vrot.slane %v925_v58, 4 }
  0xea   : > { %v1312_v1 = vrot.slane %v1295_v55, 4  ;;  %v1315_v62 = vsel %vm1216_vm1, %v1295_v55, %v1314_v54  ;;  %v1321_v3 = vsel %vm1216_vm1, %v1320_v56, %v1283_v29  ;;  %v3489_v29 = vpop.permute.xlu0 %2812  ;;  %v2837_v39 = vpop.permute.xlu2 %2836  ;;  %v2774_v46 = vunpack.i.h.bf16 %v3423_v45 }
  0xeb   : > { %v1317_v0 = vsel %vm1216_vm1, %v1316_v59, %v1275_v2  ;;  %v2768_v47 = vunpack.i.h.bf16 %v3443_v20  ;;  %v2838_v48 = vunpack.i.l.bf16 %v2837_v39  ;;  %v2773_v49 = vunpack.i.l.bf16 %v3423_v45 }
  0xec   : > { %v1313_v5 = vsel %vm1216_vm1, %v1312_v1, %v1271_v36  ;;  %v3494_v36 = vpop.permute.xlu1 %2795  ;;  %v2839_v50 = vunpack.i.h.bf16 %v2837_v39  ;;  %v2809_v30 = vunpack.i.h.bf16 %v2807_v63  ;;  %v2808_v52 = vunpack.i.l.bf16 %v2807_v63 }
  0xed   : > { %v2767_v31 = vunpack.i.l.bf16 %v3443_v20  ;;  %v2792_v55 = vunpack.i.h.bf16 %v3438_v7  ;;  %v2791_v56 = vunpack.i.l.bf16 %v3438_v7  ;;  %v3507_v1 = vmul.f32 %v2768_v47, %v1315_v62 }
  0xee   : > { %v938_v11 = vpop.f32.mrf.mxu2  ;;  %v3511_v45 = vmul.f32 %v2838_v48, %v1325_v61  ;;  %v2814_v63 = vunpack.i.l.bf16 %v3489_v29  ;;  %v3517_v20 = vmul.f32 %v2839_v50, %v3468_v53 }
  0xef   : > { %v1328_v12 = vrot.slane %v938_v11, 4  ;;  %v1331_v14 = vsel %vm1216_vm1, %v938_v11, %v1330_v8  ;;  %v951_v15 = vpop.f32.mrf.mxu3  ;;  %v914_v22 = vpop.f32.mrf.mxu0  ;;  %v3509_v8 = vmul.f32 %v2774_v46, %v1319_v60  ;;  %v3519_v11 = vmul.f32 %v2808_v52, %v1321_v3 }
  0xf0   : > { %v1339_v16 = vperm.slane %v1331_v14, %v3421_v44  ;;  %v1340_v17 = vrot.slane %v951_v15, 4  ;;  %v1343_v18 = vsel %vm1216_vm1, %v951_v15, %v1342_v10  ;;  %v927_v23 = vpop.f32.mrf.mxu1  ;;  %v3514_v10 = vmul.f32 %v2773_v49, %v1317_v0 }
  0xf1   : > { %v1329_v41 = vsel %vm1216_vm1, %v1328_v12, %v912_v57  ;;  %v1351_v24 = vperm.slane %v1343_v18, %v3421_v44  ;;  %v1885_v12 = vmul.f32 %v2809_v30, %v1323_v21  ;;  %v3521_v15 = vmul.f32 %v2767_v31, %v1313_v5 }
  0xf2   : > { %v1335_v25 = vperm.slane %v1329_v41, %v3421_v44  ;;  %v1390_v26 = vrot.slane %v1339_v16, 4  ;;  %v1341_v9 = vsel %vm1216_vm1, %v1340_v17, %v925_v58  ;;  %v2815_v58 = vunpack.i.h.bf16 %v3489_v29  ;;  %v3505_v59 = vpop.permute.xlu0 %2841 }
  0xf3   : > { %v1347_v2 = vperm.slane %v1341_v9, %v3421_v44  ;;  %v1388_v27 = vrot.slane %v1351_v24, 4  ;;  %v2844_v61 = vunpack.i.h.bf16 %v3505_v59 }
  0xf4   : > { %v1378_v28 = vrot.slane %v1335_v25, 4  ;;  %v1391_v33 = vsel %vm1216_vm1, %v1351_v24, %v1390_v26  ;;  %v2819_v17 = vpop.permute.xlu1 %2818 }
  0xf5   : > { %v1376_v34 = vrot.slane %v1347_v2, 4  ;;  %v1389_v35 = vsel %vm1216_vm1, %v1388_v27, %v1339_v16  ;;  %v1399_v3 = vperm.slane %v1391_v33, %v3440_v13  ;;  %v2843_v33 = vunpack.i.l.bf16 %v3505_v59 }
  0xf6   : > { %v1379_v37 = vsel %vm1216_vm1, %v1347_v2, %v1378_v28  ;;  %v940_v38 = vpop.f32.mrf.mxu2  ;;  %v1395_v24 = vperm.slane %v1389_v35, %v3440_v13  ;;  %v2820_v39 = vunpack.i.l.bf16 %v2819_v17 }
  0xf7   : > { %v1377_v40 = vsel %vm1216_vm1, %v1376_v34, %v1335_v25  ;;  %v953_v42 = vpop.f32.mrf.mxu3  ;;  %v964_v19 = vpop.f32.mrf.mxu0  ;;  %v1387_v21 = vperm.slane %v1379_v37, %v3440_v13  ;;  %v2821_v34 = vunpack.i.h.bf16 %v2819_v17 }
  0xf8   : > { %v977_v43 = vpop.f32.mrf.mxu1  ;;  %v1354_v54 = vrot.slane %v964_v19, 4  ;;  %v1383_v25 = vperm.slane %v1377_v40, %v3440_v13  ;;  %v1438_v42 = vrot.slane %v1399_v3, 4  ;;  %v1434_v40 = vrot.slane %v1395_v24, 4 }
  0xf9   : > { %v1366_v57 = vrot.slane %v977_v43, 4  ;;  %v1430_v48 = vrot.slane %v1387_v21, 4 }
  0xfa   : > { %v1426_v47 = vrot.slane %v1383_v25, 4 }
  0xfe   : > { %v990_v14 = vpop.f32.mrf.mxu2 }
  0xff   : > { %v1352_v16 = vrot.slane %v990_v14, 4  ;;  %v1355_v62 = vsel %vm1216_vm1, %v990_v14, %v1354_v54  ;;  %v1003_v60 = vpop.f32.mrf.mxu3  ;;  %v966_v53 = vpop.f32.mrf.mxu0 }
 0x100   : > { %v1363_v18 = vperm.slane %v1355_v62, %v3421_v44  ;;  %v1364_v0 = vrot.slane %v1003_v60, 4  ;;  %v1367_v22 = vsel %vm1216_vm1, %v1003_v60, %v1366_v57  ;;  %v979_v23 = vpop.f32.mrf.mxu1 }
 0x101   : > { %v1353_v5 = vsel %vm1216_vm1, %v1352_v16, %v964_v19  ;;  %v1375_v41 = vperm.slane %v1367_v22, %v3421_v44 }
 0x102   : > { %v1359_v26 = vperm.slane %v1353_v5, %v3421_v44  ;;  %v1414_v9 = vrot.slane %v1363_v18, 4  ;;  %v1365_v2 = vsel %vm1216_vm1, %v1364_v0, %v977_v43 }
 0x103   : > { %v1371_v27 = vperm.slane %v1365_v2, %v3421_v44  ;;  %v1412_v28 = vrot.slane %v1375_v41, 4 }
 0x104   : > { %v1402_v37 = vrot.slane %v1359_v26, 4  ;;  %v1415_v38 = vsel %vm1216_vm1, %v1375_v41, %v1414_v9 }
 0x105   : > { %v1400_v19 = vrot.slane %v1371_v27, 4  ;;  %v1413_v35 = vsel %vm1216_vm1, %v1412_v28, %v1363_v18  ;;  %v1423_v46 = vperm.slane %v1415_v38, %v3440_v13 }
 0x106   : > { %v1403_v43 = vsel %vm1216_vm1, %v1371_v27, %v1402_v37  ;;  %v1419_v49 = vperm.slane %v1413_v35, %v3440_v13  ;;  %v992_v50 = vpop.f32.mrf.mxu2 }
 0x107   : > { %v1401_v30 = vsel %vm1216_vm1, %v1400_v19, %v1359_v26  ;;  %v1411_v52 = vperm.slane %v1403_v43, %v3440_v13  ;;  %v1436_v31 = vrot.slane %v1423_v46, 4  ;;  %v1439_v54 = vsel %vm1216_vm1, %v1423_v46, %v1438_v42  ;;  %v1005_v57 = vpop.f32.mrf.mxu3  ;;  %v1016_v60 = vpop.f32.mrf.mxu0 }
 0x108   : > { %v1407_v59 = vperm.slane %v1401_v30, %v3440_v13  ;;  %v1432_v14 = vrot.slane %v1419_v49, 4  ;;  %v1435_v16 = vsel %vm1216_vm1, %v1419_v49, %v1434_v40  ;;  %v1894_v62 = vmul.f32 %v2844_v61, %v1439_v54  ;;  %v1029_v17 = vpop.f32.mrf.mxu1 }
 0x109   : > { %v1428_v18 = vrot.slane %v1411_v52, 4  ;;  %v1431_v0 = vsel %vm1216_vm1, %v1411_v52, %v1430_v48  ;;  %v1886_v22 = vmul.f32 %v2821_v34, %v1435_v16  ;;  %v1437_v53 = vsel %vm1216_vm1, %v1436_v31, %v1399_v3 }
 0x10a   : > { %v1424_v23 = vrot.slane %v1407_v59, 4  ;;  %v1427_v5 = vsel %vm1216_vm1, %v1407_v59, %v1426_v47  ;;  %v1878_v41 = vmul.f32 %v2792_v55, %v1431_v0  ;;  %v1433_v26 = vsel %vm1216_vm1, %v1432_v14, %v1395_v24 }
 0x10b   : > { %v1429_v9 = vsel %vm1216_vm1, %v1428_v18, %v1387_v21  ;;  %v1870_v61 = vmul.f32 %v2815_v58, %v1427_v5  ;;  %v1882_v2 = vmul.f32 %v2820_v39, %v1433_v26  ;;  %v3556_v27 = vadd.f32 %v1886_v22, %v1885_v12  ;;  %v3596_v18 = vpop.permute.xlu1 %2830 }
 0x10c   : > { %v1425_v28 = vsel %vm1216_vm1, %v1424_v23, %v1383_v25  ;;  %v1874_v3 = vmul.f32 %v2791_v56, %v1429_v9  ;;  %v3562_v34 = vadd.f32 %v1878_v41, %v3509_v8  ;;  %v1890_v37 = vmul.f32 %v2843_v33, %v1437_v53 }
 0x10d   : > { %v1866_v55 = vmul.f32 %v2814_v63, %v1425_v28  ;;  %v3567_v21 = vadd.f32 %v1870_v61, %v3507_v1  ;;  %v3570_v58 = vadd.f32 %v1882_v2, %v3519_v11  ;;  %v3573_v12 = vadd.f32 %v1894_v62, %v3517_v20 }
 0x10e   : > { %v3576_v24 = vadd.f32 %v1874_v3, %v3514_v10  ;;  %v3579_v7 = vadd.f32 %v1890_v37, %v3511_v45  ;;  %v1042_v56 = vpop.f32.mrf.mxu2  ;;  %v1454_v39 = vrot.slane %v1029_v17, 4  ;;  %v1442_v20 = vrot.slane %v1016_v60, 4 }
 0x10f   : > { %v3582_v8 = vadd.f32 %v1866_v55, %v3521_v15  ;;  %v1055_v29 = vpop.f32.mrf.mxu3  ;;  %v1018_v63 = vpop.f32.mrf.mxu0  ;;  %v1440_v19 = vrot.slane %v1042_v56, 4 }
 0x110   : > { %v1031_v1 = vpop.f32.mrf.mxu1  ;;  %v1452_v10 = vrot.slane %v1055_v29, 4  ;;  %v1455_v45 = vsel %vm1216_vm1, %v1055_v29, %v1454_v39  ;;  %v1443_v15 = vsel %vm1216_vm1, %v1042_v56, %v1442_v20  ;;  %v2804_v29 = vunpack.i.h.bf16 %v3456_v32 }
 0x111   : > { %v1441_v30 = vsel %vm1216_vm1, %v1440_v19, %v1016_v60  ;;  %v1463_v54 = vperm.slane %v1455_v45, %v3421_v44  ;;  %v1451_v59 = vperm.slane %v1443_v15, %v3421_v44  ;;  %v2803_v63 = vunpack.i.l.bf16 %v3456_v32 }
 0x112   : > { %v1453_v31 = vsel %vm1216_vm1, %v1452_v10, %v1029_v17  ;;  %v1447_v62 = vperm.slane %v1441_v30, %v3421_v44  ;;  %v2827_v20 = vunpack.i.h.bf16 %v3480_v6 }
 0x113   : > { %v1459_v0 = vperm.slane %v1453_v31, %v3421_v44  ;;  %v1500_v22 = vrot.slane %v1463_v54, 4  ;;  %v1502_v5 = vrot.slane %v1451_v59, 4  ;;  %v2848_v45 = vpop.permute.xlu1 %2847 }
 0x114   : > { %v1490_v9 = vrot.slane %v1447_v62, 4 }
 0x115   : > { %v1488_v3 = vrot.slane %v1459_v0, 4  ;;  %v1501_v55 = vsel %vm1216_vm1, %v1500_v22, %v1451_v59  ;;  %v1503_v1 = vsel %vm1216_vm1, %v1463_v54, %v1502_v5 }
 0x116   : > { %v1044_v25 = vpop.f32.mrf.mxu2  ;;  %v1507_v19 = vperm.slane %v1501_v55, %v3440_v13 }
 0x117   : > { %v1057_v33 = vpop.f32.mrf.mxu3  ;;  %v1068_v11 = vpop.f32.mrf.mxu0 }
 0x118   : > { %v1081_v38 = vpop.f32.mrf.mxu1  ;;  %v1466_v35 = vrot.slane %v1068_v11, 4  ;;  %v2780_v33 = vunpack.i.h.bf16 %v3451_v51 }
 0x119   : > { %v1478_v42 = vrot.slane %v1081_v38, 4 }
 0x11e   : > { %v1094_v40 = vpop.f32.mrf.mxu2 }
 0x11f   : > { %v1464_v46 = vrot.slane %v1094_v40, 4  ;;  %v1107_v47 = vpop.f32.mrf.mxu3  ;;  %v1070_v49 = vpop.f32.mrf.mxu0  ;;  %v1467_v57 = vsel %vm1216_vm1, %v1094_v40, %v1466_v35 }
 0x120   : > { %v1476_v48 = vrot.slane %v1107_v47, 4  ;;  %v1479_v43 = vsel %vm1216_vm1, %v1107_v47, %v1478_v42  ;;  %v1083_v50 = vpop.f32.mrf.mxu1  ;;  %v1475_v17 = vperm.slane %v1467_v57, %v3421_v44  ;;  %v1489_v42 = vsel %vm1216_vm1, %v1488_v3, %v1447_v62 }
 0x121   : > { %v1465_v52 = vsel %vm1216_vm1, %v1464_v46, %v1068_v11  ;;  %v1487_v16 = vperm.slane %v1479_v43, %v3421_v44  ;;  %v2779_v11 = vunpack.i.l.bf16 %v3451_v51  ;;  %v1511_v46 = vperm.slane %v1503_v1, %v3440_v13 }
 0x122   : > { %v1477_v14 = vsel %vm1216_vm1, %v1476_v48, %v1081_v38  ;;  %v1471_v60 = vperm.slane %v1465_v52, %v3421_v44  ;;  %v1526_v37 = vrot.slane %v1475_v17, 4  ;;  %v1491_v38 = vsel %vm1216_vm1, %v1459_v0, %v1490_v9 }
 0x123   : > { %v1483_v53 = vperm.slane %v1477_v14, %v3421_v44  ;;  %v1524_v41 = vrot.slane %v1487_v16, 4  ;;  %v1499_v48 = vperm.slane %v1491_v38, %v3440_v13  ;;  %v2826_v52 = vunpack.i.l.bf16 %v3480_v6 }
 0x124   : > { %v1514_v61 = vrot.slane %v1471_v60, 4  ;;  %v1527_v10 = vsel %vm1216_vm1, %v1487_v16, %v1526_v37  ;;  %v1495_v31 = vperm.slane %v1489_v42, %v3440_v13  ;;  %v2786_v16 = vunpack.i.h.bf16 %v3477_v4 }
 0x125   : > { %v1512_v56 = vrot.slane %v1483_v53, 4  ;;  %v1525_v25 = vsel %vm1216_vm1, %v1524_v41, %v1475_v17  ;;  %v1535_v54 = vperm.slane %v1527_v10, %v3440_v13  ;;  %v2798_v62 = vunpack.i.h.bf16 %v3494_v36 }
 0x126   : > { %v1096_v23 = vpop.f32.mrf.mxu2  ;;  %v1515_v39 = vsel %vm1216_vm1, %v1483_v53, %v1514_v61  ;;  %v1531_v40 = vperm.slane %v1525_v25, %v3440_v13  ;;  %v2850_v0 = vunpack.i.h.bf16 %v2848_v45  ;;  %v1546_v17 = vrot.slane %v1507_v19, 4 }
 0x127   : > { %v1109_v26 = vpop.f32.mrf.mxu3  ;;  %v1120_v2 = vpop.f32.mrf.mxu0  ;;  %v1513_v35 = vsel %vm1216_vm1, %v1512_v56, %v1471_v60  ;;  %v1523_v43 = vperm.slane %v1515_v39, %v3440_v13  ;;  %v1550_v53 = vrot.slane %v1511_v46, 4  ;;  %v1542_v6 = vrot.slane %v1499_v48, 4 }
 0x128   : > { %v1133_v28 = vpop.f32.mrf.mxu1  ;;  %v1554_v49 = vrot.slane %v1120_v2, 4  ;;  %v1519_v60 = vperm.slane %v1513_v35, %v3440_v13  ;;  %v1544_v22 = vrot.slane %v1531_v40, 4  ;;  %v1538_v9 = vrot.slane %v1495_v31, 4 }
 0x129   : > { %v1566_v47 = vrot.slane %v1133_v28, 4  ;;  %v1540_v5 = vrot.slane %v1523_v43, 4  ;;  %v1548_v61 = vrot.slane %v1535_v54, 4  ;;  %v1551_v3 = vsel %vm1216_vm1, %v1535_v54, %v1550_v53 }
 0x12a   : > { %v1536_v55 = vrot.slane %v1519_v60, 4  ;;  %v1543_v56 = vsel %vm1216_vm1, %v1523_v43, %v1542_v6  ;;  %v1547_v1 = vsel %vm1216_vm1, %v1531_v40, %v1546_v17  ;;  %v1539_v38 = vsel %vm1216_vm1, %v1519_v60, %v1538_v9 }
 0x12b   : > { %v1545_v39 = vsel %vm1216_vm1, %v1544_v22, %v1507_v19  ;;  %v2785_v35 = vunpack.i.l.bf16 %v3477_v4  ;;  %v2797_v40 = vunpack.i.l.bf16 %v3494_v36  ;;  %v2833_v53 = vunpack.i.h.bf16 %v3596_v18 }
 0x12c   : > { %v1537_v17 = vsel %vm1216_vm1, %v1536_v55, %v1495_v31 }
 0x12d   : > { %v1867_v31 = vmul.f32 %v2779_v11, %v1537_v17 }
 0x12e   : > { %v1146_v15 = vpop.f32.mrf.mxu2 }
 0x12f   : > { %v1552_v50 = vrot.slane %v1146_v15, 4  ;;  %v1159_v30 = vpop.f32.mrf.mxu3  ;;  %v1122_v59 = vpop.f32.mrf.mxu0  ;;  %v1555_v26 = vsel %vm1216_vm1, %v1146_v15, %v1554_v49  ;;  %v1879_v49 = vmul.f32 %v2798_v62, %v1543_v56 }
 0x130   : > { %v1564_v57 = vrot.slane %v1159_v30, 4  ;;  %v1135_v14 = vpop.f32.mrf.mxu1  ;;  %v1567_v23 = vsel %vm1216_vm1, %v1159_v30, %v1566_v47  ;;  %v1563_v42 = vperm.slane %v1555_v26, %v3421_v44  ;;  %v2849_v47 = vunpack.i.l.bf16 %v2848_v45 }
 0x131   : > { %v1553_v41 = vsel %vm1216_vm1, %v1552_v50, %v1120_v2  ;;  %v1575_v25 = vperm.slane %v1567_v23, %v3421_v44  ;;  %v1887_v50 = vmul.f32 %v2827_v20, %v1547_v1  ;;  %v1549_v30 = vsel %vm1216_vm1, %v1548_v61, %v1511_v46 }
 0x132   : > { %v1565_v37 = vsel %vm1216_vm1, %v1564_v57, %v1133_v28  ;;  %v1559_v2 = vperm.slane %v1553_v41, %v3421_v44  ;;  %v1541_v28 = vsel %vm1216_vm1, %v1540_v5, %v1499_v48  ;;  %v1871_v57 = vmul.f32 %v2780_v33, %v1539_v38 }
 0x133   : > { %v1571_v15 = vperm.slane %v1565_v37, %v3421_v44  ;;  %v1883_v59 = vmul.f32 %v2826_v52, %v1545_v39  ;;  %v1895_v14 = vmul.f32 %v2850_v0, %v1551_v3  ;;  %v1612_v60 = vrot.slane %v1575_v25, 4  ;;  %v2854_v3 = vpop.permute.xlu2 %2853 }
 0x134   : > { %v1875_v22 = vmul.f32 %v2797_v40, %v1541_v28  ;;  %v1602_v48 = vrot.slane %v1559_v2, 4  ;;  %v1614_v45 = vrot.slane %v1563_v42, 4  ;;  %v1891_v23 = vmul.f32 %v2849_v47, %v1549_v30 }
 0x135   : > { %v1600_v6 = vrot.slane %v1571_v15, 4  ;;  %v2832_v20 = vunpack.i.l.bf16 %v3596_v18  ;;  %v3647_v46 = vadd.f32 %v3562_v34, %v1879_v49  ;;  %v3650_v33 = vadd.f32 %v3556_v27, %v1887_v50 }
 0x136   : > { %v1148_v10 = vpop.f32.mrf.mxu2  ;;  %v3655_v62 = vadd.f32 %v3567_v21, %v1871_v57  ;;  %v3658_v0 = vadd.f32 %v3570_v58, %v1883_v59  ;;  %v1613_v5 = vsel %vm1216_vm1, %v1612_v60, %v1563_v42  ;;  %v3662_v41 = vadd.f32 %v3576_v24, %v1875_v22 }
 0x137   : > { %v1161_v43 = vpop.f32.mrf.mxu3  ;;  %v1172_v19 = vpop.f32.mrf.mxu0  ;;  %v3665_v34 = vadd.f32 %v3573_v12, %v1895_v14  ;;  %v1603_v27 = vsel %vm1216_vm1, %v1571_v15, %v1602_v48  ;;  %v1615_v26 = vsel %vm1216_vm1, %v1575_v25, %v1614_v45  ;;  %v3670_v11 = vadd.f32 %v3579_v7, %v1891_v23 }
 0x138   : > { %v1185_v54 = vpop.f32.mrf.mxu1  ;;  %v1578_v36 = vrot.slane %v1172_v19, 4  ;;  %v1601_v21 = vsel %vm1216_vm1, %v1600_v6, %v1559_v2  ;;  %v1619_v24 = vperm.slane %v1613_v5, %v3440_v13  ;;  %v1611_v25 = vperm.slane %v1603_v27, %v3440_v13 }
 0x139   : > { %v1590_v52 = vrot.slane %v1185_v54, 4  ;;  %v1623_v39 = vperm.slane %v1615_v26, %v3440_v13  ;;  %v1607_v2 = vperm.slane %v1601_v21, %v3440_v13  ;;  %v1898_v47 = vadd.f32 %v3582_v8, %v1867_v31 }
 0x13a   : > { %v2856_v40 = vunpack.i.h.bf16 %v2854_v3  ;;  %v1658_v49 = vrot.slane %v1619_v24, 4  ;;  %v1654_v22 = vrot.slane %v1611_v25, 4 }
 0x13b   : > { %v1662_v60 = vrot.slane %v1623_v39, 4  ;;  %v1650_v17 = vrot.slane %v1607_v2, 4 }
 0x13e   : > { %v1198_v51 = vpop.f32.mrf.mxu2 }
 0x13f   : > { %v1576_v58 = vrot.slane %v1198_v51, 4  ;;  %v1579_v9 = vsel %vm1216_vm1, %v1198_v51, %v1578_v36  ;;  %v1211_v61 = vpop.f32.mrf.mxu3  ;;  %v1174_v56 = vpop.f32.mrf.mxu0 }
 0x140   : > { %v1587_v12 = vperm.slane %v1579_v9, %v3421_v44  ;;  %v1588_v37 = vrot.slane %v1211_v61, 4  ;;  %v1591_v55 = vsel %vm1216_vm1, %v1211_v61, %v1590_v52  ;;  %v1187_v1 = vpop.f32.mrf.mxu1 }
 0x141   : > { %v1577_v7 = vsel %vm1216_vm1, %v1576_v58, %v1172_v19  ;;  %v1599_v38 = vperm.slane %v1591_v55, %v3421_v44  ;;  %v2855_v19 = vunpack.i.l.bf16 %v2854_v3 }
 0x142   : > { %v1583_v42 = vperm.slane %v1577_v7, %v3421_v44  ;;  %v1638_v10 = vrot.slane %v1587_v12, 4  ;;  %v1589_v28 = vsel %vm1216_vm1, %v1588_v37, %v1185_v54 }
 0x143   : > { %v1595_v15 = vperm.slane %v1589_v28, %v3421_v44  ;;  %v1636_v43 = vrot.slane %v1599_v38, 4 }
 0x144   : > { %v1626_v50 = vrot.slane %v1583_v42, 4  ;;  %v1639_v30 = vsel %vm1216_vm1, %v1599_v38, %v1638_v10 }
 0x145   : > { %v1624_v57 = vrot.slane %v1595_v15, 4  ;;  %v1637_v59 = vsel %vm1216_vm1, %v1636_v43, %v1587_v12  ;;  %v1647_v14 = vperm.slane %v1639_v30, %v3440_v13 }
 0x146   : > { %v1627_v54 = vsel %vm1216_vm1, %v1595_v15, %v1626_v50  ;;  %v1643_v8 = vperm.slane %v1637_v59, %v3440_v13  ;;  %v1200_v44 = vpop.f32.mrf.mxu2 }
 0x147   : > { %v1625_v48 = vsel %vm1216_vm1, %v1624_v57, %v1583_v42  ;;  %v1635_v45 = vperm.slane %v1627_v54, %v3440_v13  ;;  %v1660_v23 = vrot.slane %v1647_v14, 4  ;;  %v1663_v6 = vsel %vm1216_vm1, %v1647_v14, %v1662_v60  ;;  %v1213_v36 = vpop.f32.mrf.mxu3  ;;  %v2001_v26 = vpop.f32.mrf.mxu0 }
 0x148   : > { %v1631_v52 = vperm.slane %v1625_v48, %v3440_v13  ;;  %v1656_v31 = vrot.slane %v1643_v8, 4  ;;  %v1659_v5 = vsel %vm1216_vm1, %v1643_v8, %v1658_v49  ;;  %v1896_v27 = vmul.f32 %v2856_v40, %v1663_v6  ;;  %v2026_v51 = vpop.f32.mrf.mxu1 }
 0x149   : > { %v1652_v21 = vrot.slane %v1635_v45, 4  ;;  %v1655_v58 = vsel %vm1216_vm1, %v1635_v45, %v1654_v22  ;;  %v1888_v9 = vmul.f32 %v2833_v53, %v1659_v5  ;;  %v1661_v61 = vsel %vm1216_vm1, %v1660_v23, %v1623_v39 }
 0x14a   : > { %v1648_v3 = vrot.slane %v1631_v52, 4  ;;  %v1651_v12 = vsel %vm1216_vm1, %v1631_v52, %v1650_v17  ;;  %v1657_v37 = vsel %vm1216_vm1, %v1656_v31, %v1619_v24  ;;  %v1880_v13 = vmul.f32 %v2804_v29, %v1655_v58 }
 0x14b   : > { %v1653_v55 = vsel %vm1216_vm1, %v1652_v21, %v1611_v25  ;;  %v1872_v56 = vmul.f32 %v2786_v16, %v1651_v12  ;;  %v1884_v1 = vmul.f32 %v2832_v20, %v1657_v37  ;;  %v1944_v53 = vadd.f32 %v3650_v33, %v1888_v9 }
 0x14c   : > { %v1649_v7 = vsel %vm1216_vm1, %v1648_v3, %v1607_v2  ;;  %v1876_v38 = vmul.f32 %v2803_v63, %v1653_v55  ;;  %v1926_v24 = vadd.f32 %v3647_v46, %v1880_v13  ;;  %v1892_v39 = vmul.f32 %v2855_v19, %v1661_v61 }
 0x14d   : > { %v1868_v29 = vmul.f32 %v2785_v35, %v1649_v7  ;;  %v1908_v25 = vadd.f32 %v3655_v62, %v1872_v56  ;;  %v1935_v16 = vadd.f32 %v3658_v0, %v1884_v1  ;;  %v1945_v42 = vrot.slane %v1944_v53, 4 }
 0x14e   : > { %v1917_v18 = vadd.f32 %v3662_v41, %v1876_v38  ;;  %v1927_v20 = vrot.slane %v1926_v24, 4  ;;  %v1953_v33 = vadd.f32 %v3670_v11, %v1892_v39  ;;  %v1962_v2 = vadd.f32 %v3665_v34, %v1896_v27 }
 0x14f   : > { %v1899_v32 = vadd.f32 %v1898_v47, %v1868_v29  ;;  %v1909_v63 = vrot.slane %v1908_v25, 4  ;;  %v1936_v10 = vrot.slane %v1935_v16, 4  ;;  %v1946_v46 = vadd.f32 %v1945_v42, %v1944_v53  ;;  %v2003_v43 = vpop.f32.mrf.mxu0 }
 0x150   : > { %v1918_v28 = vrot.slane %v1917_v18, 4  ;;  %v1928_v15 = vadd.f32 %v1927_v20, %v1926_v24  ;;  %v1954_v4 = vrot.slane %v1953_v33, 4  ;;  %v1963_v35 = vrot.slane %v1962_v2, 4  ;;  %v2028_v62 = vpop.f32.mrf.mxu1 }
 0x151   : > { %v1900_v40 = vrot.slane %v1899_v32, 4  ;;  %v1910_v0 = vadd.f32 %v1909_v63, %v1908_v25  ;;  %v1937_v49 = vadd.f32 %v1936_v10, %v1935_v16  ;;  %v1947_v50 = vrot.slane %v1946_v46, 2  ;;  %v2858_v16 = vld [vmem:[%s3769_s5] ss:$0 sm:$0xff] }
 0x152   : > { %v1919_v41 = vadd.f32 %v1918_v28, %v1917_v18  ;;  %v1929_v30 = vrot.slane %v1928_v15, 2  ;;  %v1955_v19 = vadd.f32 %v1954_v4, %v1953_v33  ;;  %v1964_v11 = vadd.f32 %v1963_v35, %v1962_v2 }
 0x153   : > { %v1901_v57 = vadd.f32 %v1900_v40, %v1899_v32  ;;  %v1911_v34 = vrot.slane %v1910_v0, 2  ;;  %v1938_v47 = vrot.slane %v1937_v49, 2  ;;  %v1948_v59 = vadd.f32 %v1947_v50, %v1946_v46 }
 0x154   : > { %v1920_v14 = vrot.slane %v1919_v41, 2  ;;  %v1930_v60 = vadd.f32 %v1929_v30, %v1928_v15  ;;  %v1956_v17 = vrot.slane %v1955_v19, 2  ;;  %v1965_v22 = vrot.slane %v1964_v11, 2 }
 0x155   : > { %v1902_v54 = vrot.slane %v1901_v57, 2  ;;  %v1912_v8 = vadd.f32 %v1911_v34, %v1910_v0  ;;  %v1939_v44 = vadd.f32 %v1938_v47, %v1937_v49  ;;  %v2027_v48 = vadd.f32 %v2026_v51, %v2001_v26 }
 0x156   : > { %v1921_v45 = vadd.f32 %v1920_v14, %v1919_v41  ;;  %v1931_v23 = vrot.slane %v1930_v60, 1  ;;  %v1957_v6 = vadd.f32 %v1956_v17, %v1955_v19  ;;  %v1966_v36 = vadd.f32 %v1965_v22, %v1964_v11 }
 0x157   : > { %v1903_v52 = vadd.f32 %v1902_v54, %v1901_v57  ;;  %v1913_v31 = vrot.slane %v1912_v8, 1  ;;  %v1940_v5 = vrot.slane %v1939_v44, 1  ;;  %v1949_v27 = vrot.slane %v1948_v59, 1 }
 0x158   : > { %v1922_v21 = vrot.slane %v1921_v45, 1  ;;  %v1958_v58 = vrot.slane %v1957_v6, 1  ;;  %v1967_v9 = vrot.slane %v1966_v36, 1  ;;  %v1932_v61 = vadd.f32 %v1931_v23, %v1930_v60 }
 0x159   : > { %v1904_v3 = vrot.slane %v1903_v52, 1  ;;  %v1914_v12 = vadd.f32 %v1913_v31, %v1912_v8  ;;  %v1941_v37 = vadd.f32 %v1940_v5, %v1939_v44  ;;  %v1950_v13 = vadd.f32 %v1949_v27, %v1948_v59 }
 0x15a   : > { %v1959_v55 = vadd.f32 %v1958_v58, %v1957_v6  ;;  %v1968_v56 = vadd.f32 %v1967_v9, %v1966_v36  ;;  %v1923_v26 = vadd.f32 %v1922_v21, %v1921_v45  ;;  %v2031_v51 = vrot.slane %v2027_v48, 1 }
 0x15b   : > { %v1905_v1 = vadd.f32 %v1904_v3, %v1903_v52  ;;  %v2032_v53 = vrot.slane %v2027_v48, 2  ;;  %v2033_v7 = vrot.slane %v2027_v48, 3  ;;  %v2034_v38 = vrot.slane %v2027_v48, 4 }
 0x15c   : > { %v2035_v24 = vrot.slane %v2027_v48, 5  ;;  %v2036_v39 = vrot.slane %v2027_v48, 6  ;;  %v2037_v29 = vrot.slane %v2027_v48, 7  ;;  %v2047_v25 = vadd.f32 %v2031_v51, %v1914_v12 }
 0x15d   : > { %v2046_v42 = vadd.f32 %v2027_v48, %v1905_v1  ;;  %v2048_v18 = vadd.f32 %v2032_v53, %v1923_v26  ;;  %v2049_v20 = vadd.f32 %v2033_v7, %v1932_v61  ;;  %v2050_v33 = vadd.f32 %v2034_v38, %v1941_v37 }
 0x15e   : > { %v2051_v2 = vadd.f32 %v2035_v24, %v1950_v13  ;;  %v2052_v32 = vadd.f32 %v2036_v39, %v1959_v55  ;;  %v2053_v63 = vadd.f32 %v2037_v29, %v1968_v56  ;;  %v2059_v10 = vadd.f32 %v2858_v16, %v2047_v25 }
 0x15f   : > { %v2058_v46 = vadd.f32 %v2858_v16, %v2046_v42  ;;  %v2060_v28 = vadd.f32 %v2858_v16, %v2048_v18  ;;  %v2061_v15 = vadd.f32 %v2858_v16, %v2049_v20  ;;  %v2062_v4 = vadd.f32 %v2858_v16, %v2050_v33 }
 0x160   : > { %v2063_v35 = vadd.f32 %v2858_v16, %v2051_v2  ;;  %v2074_v43 = vrot.slane %v2059_v10, 7  ;;  %v2064_v62 = vadd.f32 %v2858_v16, %v2052_v32  ;;  %v2065_v0 = vadd.f32 %v2858_v16, %v2053_v63 }
 0x161   : > { %v2077_v40 = vrot.slane %v2060_v28, 6  ;;  %v2080_v50 = vrot.slane %v2061_v15, 5  ;;  %v2083_v30 = vrot.slane %v2062_v4, 4 }
 0x162   : > { %v2076_v49 = vsel %vm2075_vm2, %v2074_v43, %v2058_v46  ;;  %v2086_v11 = vrot.slane %v2063_v35, 3  ;;  %v2089_v34 = vrot.slane %v2064_v62, 2  ;;  %v2092_v59 = vrot.slane %v2065_v0, 1 }
 0x163   : > { %v2079_v41 = vsel %vm2078_vm3, %v2077_v40, %v2076_v49 }
 0x164   : > { %v2082_v19 = vsel %vm2081_vm4, %v2080_v50, %v2079_v41 }
 0x165   : > { %v2085_v57 = vsel %vm2084_vm5, %v2083_v30, %v2082_v19 }
 0x166   : > { %v2088_v47 = vsel %vm2087_vm6, %v2086_v11, %v2085_v57 }
 0x167   : > { %v2091_v14 = vsel %vm2090_vm7, %v2089_v34, %v2088_v47 }
 0x168   : > { %v2094_v60 = vsel %vm2093_vm8, %v2092_v59, %v2091_v14 }
 0x169   : > { %2096 = vst [vmem:[%s403_s24] sm:$0xff] %v2094_v60 }
 0x16a   : > { %3036 = shalt.err (!%p3033_p13)
}
 0x16b   : > { %2675 = dma.vmem_to_hbm [thread:$0]  (%p3236_p4), %s2112_s29, 128, %s2114_s30, %s2098_s8  }
 0x16c PF: > { %s2125_s13 = sand.u32 1, %s3083_s21   ;;  %p2695_p0 = pnand %p2269_p6, %p3244_p7 }
 0x16d   : > { %s2126_s3 = scalar_lea.sflag [#allocation4], %s2125_s13 }
 0x16e   : > { %p2696_p2 = pneg %p2695_p0 }
 0x170   : > { %3078 = dma.done.wait (%p2696_p2), %s2126_s3, 128  }
 0x171   : > { %3080 = vsyncadd (%p2696_p2), %s2126_s3, 4294967168  ;;  %s26_s26 = sadd.s32 1, %s3103_s26   ;;  %s3790_s4 = sld [smem:[#allocation17_spill]] }
 0x172   : > { %p23_p5 = scmp.ge.s32.totalorder %s26_s26, 4   ;;  %s3791_s23 = sld [smem:[#allocation20_spill]] }
 0x173   : > { %s3792_s24 = sld [smem:[#allocation18_spill]]  ;;  %s3794_s21 = smov %s3087_s22 }
 0x174   : > { %s3793_s25 = sld [smem:[#allocation19_spill]]  ;;  %25 = sbr.rel (!%p23_p5) target bundleno = 13 (0xd), region = 120 }
 0x177   : > { %s3795_s22 = smov %s3790_s4 }
 0x179   :  { %2132 = vsyncpa [#allocation3], 1 }
 0x17a   :  { %2134 = vsyncpa [#allocation3 + $0x1], 1 }
 0x17b   :  { %2135 = vsyncpa [#allocation6], 1 }
 0x17c   :  { %2137 = vsyncpa [#allocation6 + $0x1], 1 }
 0x17d   :  { %2138 = vsyncpa [#allocation9], 1 }
 0x17e   :  { %2139 = vsyncpa [#allocation4], 1 }
 0x17f   :  { %2141 = vsyncpa [#allocation4 + $0x1], 1 }

</bundles_post_ra>
